<compile_context>
chip_gen: v6e
topology: v6e:2x2x1
jax: 0.10.0
libtpu: 0.0.40
codegen_flags: <defaults>
</compile_context>

<pallas_src>
import jax
import jax.numpy as jnp
from jax.experimental import pallas as pl
from jax.experimental.pallas import tpu as pltpu

LANE = 128
N_LAYERS = 7  # lift_Net: 7 Linear layers, Tanh after the first 6.


def _round_up(x, m):
    return (x + m - 1) // m * m


def _make_kernel(mxu_dtype):
    def kernel(x_ref,
               w0, b0, w1, b1, w2, b2, w3, b3, w4, b4, w5, b5, w6, b6,
               out_ref):
        layers = ((w0, b0), (w1, b1), (w2, b2), (w3, b3),
                  (w4, b4), (w5, b5), (w6, b6))
        h = x_ref[...].astype(jnp.float32)
        for i, (w_ref, b_ref) in enumerate(layers):
            # MXU matmul: operands in mxu_dtype (f32 or bf16), f32 accumulation.
            h = jnp.dot(h.astype(mxu_dtype), w_ref[...],
                        preferred_element_type=jnp.float32)
            h = h + b_ref[...]                 # f32 bias add (VPU)
            if i < len(layers) - 1:
                h = jnp.tanh(h)                # f32 tanh (EUP slot, ~free)
        out_ref[...] = h.astype(out_ref.dtype)
    return kernel


def lift_net_forward(x, params, *, batch_tile=256, mxu_dtype=jnp.float32):
    """x: [B, n_input] f32.  params: list of 7 (W, b) with W: [d_in, d_out]."""
    assert len(params) == N_LAYERS
    B, n_input = x.shape
    n_output = params[-1][0].shape[1]

    # bf16 sublane packing wants the batch tile to be a multiple of 16.
    if mxu_dtype == jnp.bfloat16 and batch_tile % 16 != 0:
        batch_tile = _round_up(batch_tile, 16)

    # Pad feature dims to lane multiples and batch to a tile multiple.
    d_in_pad = _round_up(n_input, LANE)
    d_out_pad = _round_up(n_output, LANE)
    B_pad = _round_up(max(B, batch_tile), batch_tile)

    x_p = jnp.zeros((B_pad, d_in_pad), jnp.float32).at[:B, :n_input].set(x)

    padded_params = []
    flops = 0
    for (w, b) in params:
        di, do = w.shape
        di_p, do_p = _round_up(di, LANE), _round_up(do, LANE)
        w_p = jnp.zeros((di_p, do_p), jnp.float32).at[:di, :do].set(w)
        b_p = jnp.zeros((1, do_p), jnp.float32).at[:, :do].set(b.reshape(1, -1))
        padded_params.append((w_p.astype(mxu_dtype), b_p))
        flops += 2 * B_pad * di_p * do_p

    n_hidden_pad = padded_params[0][0].shape[1]
    bytes_accessed = (x_p.size * 4 + B_pad * d_out_pad * 4
                      + sum(int(w.size) * w.dtype.itemsize + int(b.size) * 4
                            for (w, b) in padded_params))
    cost = pl.CostEstimate(flops=int(flops),
                           transcendentals=int((N_LAYERS - 1) * B_pad * n_hidden_pad),
                           bytes_accessed=int(bytes_accessed))

    # Grid-invariant blocks for weights/biases: the pipeline keeps them
    # resident in VMEM (no per-step re-DMA since the block index never changes).
    def resident(shape):
        return pl.BlockSpec(shape, lambda i: (0, 0))

    in_specs = [pl.BlockSpec((batch_tile, d_in_pad), lambda i: (i, 0))]
    flat_args = [x_p]
    for (w_p, b_p) in padded_params:
        in_specs += [resident(w_p.shape), resident(b_p.shape)]
        flat_args += [w_p, b_p]

    grid = (B_pad // batch_tile,)

    out_p = pl.pallas_call(
        _make_kernel(mxu_dtype),
        out_shape=jax.ShapeDtypeStruct((B_pad, d_out_pad), jnp.float32),
        grid_spec=pltpu.PrefetchScalarGridSpec(
            num_scalar_prefetch=0,
            grid=grid,
            in_specs=in_specs,
            out_specs=pl.BlockSpec((batch_tile, d_out_pad), lambda i: (i, 0)),
        ),
        compiler_params=pltpu.CompilerParams(
            dimension_semantics=("parallel",)),
        cost_estimate=cost,
    )(*flat_args)

    return out_p[:B, :n_output]


def init_lift_net_params(key, n_input, n_hidden, n_output):
    """Matches PyTorch init: weight ~ N(0, 0.1), bias = 0.
    Weights stored as [in, out] (transpose of nn.Linear's [out, in])."""
    dims = ([(n_input, n_hidden)]
            + [(n_hidden, n_hidden)] * 5
            + [(n_hidden, n_output)])
    params = []
    for (d_in, d_out) in dims:
        key, sub = jax.random.split(key)
        w = 0.1 * jax.random.normal(sub, (d_in, d_out), dtype=jnp.float32)
        b = jnp.zeros((d_out,), dtype=jnp.float32)
        params.append((w, b))
    return params


def lift_net_reference(x, params):
    h = x
    for i, (w, b) in enumerate(params):
        h = h @ w + b
        if i < len(params) - 1:
            h = jnp.tanh(h)
    return h


if __name__ == "__main__":
    # Small shapes consistent with the module: data is [batch, n_input].
    batch, n_input, n_hidden, n_output = 512, 16, 32, 24

    key = jax.random.PRNGKey(0)
    key, kx = jax.random.split(key)
    x = jax.random.normal(kx, (batch, n_input), dtype=jnp.float32)

    params = init_lift_net_params(key, n_input, n_hidden, n_output)
    ref = lift_net_reference(x, params)

    # f32 MXU-operand path: tight check against the pure-JAX reference.
    out_f32 = jax.block_until_ready(
        lift_net_forward(x, params, batch_tile=256, mxu_dtype=jnp.float32))
    assert out_f32.shape == (batch, n_output)
    assert jnp.allclose(out_f32, ref, atol=1e-4, rtol=1e-4), "f32 mismatch"

    # bf16 MXU-operand path (v6e / v7x fast path), f32 accumulation + f32 tanh.
    out_bf16 = jax.block_until_ready(
        lift_net_forward(x, params, batch_tile=256, mxu_dtype=jnp.bfloat16))
    assert out_bf16.shape == (batch, n_output)
    assert jnp.allclose(out_bf16, ref, atol=5e-3, rtol=5e-2), "bf16 mismatch"

    print("KERNEL_OK")
</pallas_src>

<mosaic_0001>
module attributes {stable_mosaic.version = 11 : i64} {
  func.func @kernel(%arg0: i32, %arg1: memref<256x128xf32, #tpu.memory_space<vmem>>, %arg2: memref<128x128xf32, #tpu.memory_space<vmem>>, %arg3: memref<1x128xf32, #tpu.memory_space<vmem>>, %arg4: memref<128x128xf32, #tpu.memory_space<vmem>>, %arg5: memref<1x128xf32, #tpu.memory_space<vmem>>, %arg6: memref<128x128xf32, #tpu.memory_space<vmem>>, %arg7: memref<1x128xf32, #tpu.memory_space<vmem>>, %arg8: memref<128x128xf32, #tpu.memory_space<vmem>>, %arg9: memref<1x128xf32, #tpu.memory_space<vmem>>, %arg10: memref<128x128xf32, #tpu.memory_space<vmem>>, %arg11: memref<1x128xf32, #tpu.memory_space<vmem>>, %arg12: memref<128x128xf32, #tpu.memory_space<vmem>>, %arg13: memref<1x128xf32, #tpu.memory_space<vmem>>, %arg14: memref<128x128xf32, #tpu.memory_space<vmem>>, %arg15: memref<1x128xf32, #tpu.memory_space<vmem>>, %arg16: memref<256x128xf32, #tpu.memory_space<vmem>>) attributes {dimension_semantics = [#tpu.dimension_semantics<parallel>], iteration_bounds = array<i64: 2>, scalar_prefetch = 0 : i64, scratch_operands = 0 : i64, tpu.core_type = #tpu.core_type<tc>, window_params = [{transform_indices = @transform_0, window_bounds = array<i64: 256, 128>}, {pipeline_mode = #tpu.pipeline_mode<synchronous>, transform_indices = @transform_1, window_bounds = array<i64: 128, 128>}, {pipeline_mode = #tpu.pipeline_mode<synchronous>, transform_indices = @transform_2, window_bounds = array<i64: 1, 128>}, {pipeline_mode = #tpu.pipeline_mode<synchronous>, transform_indices = @transform_3, window_bounds = array<i64: 128, 128>}, {pipeline_mode = #tpu.pipeline_mode<synchronous>, transform_indices = @transform_4, window_bounds = array<i64: 1, 128>}, {pipeline_mode = #tpu.pipeline_mode<synchronous>, transform_indices = @transform_5, window_bounds = array<i64: 128, 128>}, {pipeline_mode = #tpu.pipeline_mode<synchronous>, transform_indices = @transform_6, window_bounds = array<i64: 1, 128>}, {pipeline_mode = #tpu.pipeline_mode<synchronous>, transform_indices = @transform_7, window_bounds = array<i64: 128, 128>}, {pipeline_mode = #tpu.pipeline_mode<synchronous>, transform_indices = @transform_8, window_bounds = array<i64: 1, 128>}, {pipeline_mode = #tpu.pipeline_mode<synchronous>, transform_indices = @transform_9, window_bounds = array<i64: 128, 128>}, {pipeline_mode = #tpu.pipeline_mode<synchronous>, transform_indices = @transform_10, window_bounds = array<i64: 1, 128>}, {pipeline_mode = #tpu.pipeline_mode<synchronous>, transform_indices = @transform_11, window_bounds = array<i64: 128, 128>}, {pipeline_mode = #tpu.pipeline_mode<synchronous>, transform_indices = @transform_12, window_bounds = array<i64: 1, 128>}, {pipeline_mode = #tpu.pipeline_mode<synchronous>, transform_indices = @transform_13, window_bounds = array<i64: 128, 128>}, {pipeline_mode = #tpu.pipeline_mode<synchronous>, transform_indices = @transform_14, window_bounds = array<i64: 1, 128>}, {transform_indices = @transform_15, window_bounds = array<i64: 256, 128>}]} {
    %c0 = arith.constant 0 : index
    %c0_0 = arith.constant 0 : index
    %0 = vector.load %arg1[%c0, %c0_0] : memref<256x128xf32, #tpu.memory_space<vmem>>, vector<256x128xf32>
    %c0_1 = arith.constant 0 : index
    %c0_2 = arith.constant 0 : index
    %1 = vector.load %arg2[%c0_1, %c0_2] : memref<128x128xf32, #tpu.memory_space<vmem>>, vector<128x128xf32>
    %cst = arith.constant dense<0.000000e+00> : vector<256x128xf32>
    %2 = tpu.matmul %0, %1, %cst {dimension_numbers = #tpu.dot_dimension_numbers<[1], [0], [0], [1], [0, 0, 1, 1], [], []>} : vector<256x128xf32>, vector<128x128xf32>, vector<256x128xf32> -> vector<256x128xf32>
    %c0_3 = arith.constant 0 : index
    %c0_4 = arith.constant 0 : index
    %3 = vector.load %arg3[%c0_3, %c0_4] : memref<1x128xf32, #tpu.memory_space<vmem>>, vector<1x128xf32>
    %4 = vector.broadcast %3 : vector<1x128xf32> to vector<256x128xf32>
    %5 = arith.addf %2, %4 : vector<256x128xf32>
    %6 = math.tanh %5 : vector<256x128xf32>
    %c0_5 = arith.constant 0 : index
    %c0_6 = arith.constant 0 : index
    %7 = vector.load %arg4[%c0_5, %c0_6] : memref<128x128xf32, #tpu.memory_space<vmem>>, vector<128x128xf32>
    %cst_7 = arith.constant dense<0.000000e+00> : vector<256x128xf32>
    %8 = tpu.matmul %6, %7, %cst_7 {dimension_numbers = #tpu.dot_dimension_numbers<[1], [0], [0], [1], [0, 0, 1, 1], [], []>} : vector<256x128xf32>, vector<128x128xf32>, vector<256x128xf32> -> vector<256x128xf32>
    %c0_8 = arith.constant 0 : index
    %c0_9 = arith.constant 0 : index
    %9 = vector.load %arg5[%c0_8, %c0_9] : memref<1x128xf32, #tpu.memory_space<vmem>>, vector<1x128xf32>
    %10 = vector.broadcast %9 : vector<1x128xf32> to vector<256x128xf32>
    %11 = arith.addf %8, %10 : vector<256x128xf32>
    %12 = math.tanh %11 : vector<256x128xf32>
    %c0_10 = arith.constant 0 : index
    %c0_11 = arith.constant 0 : index
    %13 = vector.load %arg6[%c0_10, %c0_11] : memref<128x128xf32, #tpu.memory_space<vmem>>, vector<128x128xf32>
    %cst_12 = arith.constant dense<0.000000e+00> : vector<256x128xf32>
    %14 = tpu.matmul %12, %13, %cst_12 {dimension_numbers = #tpu.dot_dimension_numbers<[1], [0], [0], [1], [0, 0, 1, 1], [], []>} : vector<256x128xf32>, vector<128x128xf32>, vector<256x128xf32> -> vector<256x128xf32>
    %c0_13 = arith.constant 0 : index
    %c0_14 = arith.constant 0 : index
    %15 = vector.load %arg7[%c0_13, %c0_14] : memref<1x128xf32, #tpu.memory_space<vmem>>, vector<1x128xf32>
    %16 = vector.broadcast %15 : vector<1x128xf32> to vector<256x128xf32>
    %17 = arith.addf %14, %16 : vector<256x128xf32>
    %18 = math.tanh %17 : vector<256x128xf32>
    %c0_15 = arith.constant 0 : index
    %c0_16 = arith.constant 0 : index
    %19 = vector.load %arg8[%c0_15, %c0_16] : memref<128x128xf32, #tpu.memory_space<vmem>>, vector<128x128xf32>
    %cst_17 = arith.constant dense<0.000000e+00> : vector<256x128xf32>
    %20 = tpu.matmul %18, %19, %cst_17 {dimension_numbers = #tpu.dot_dimension_numbers<[1], [0], [0], [1], [0, 0, 1, 1], [], []>} : vector<256x128xf32>, vector<128x128xf32>, vector<256x128xf32> -> vector<256x128xf32>
    %c0_18 = arith.constant 0 : index
    %c0_19 = arith.constant 0 : index
    %21 = vector.load %arg9[%c0_18, %c0_19] : memref<1x128xf32, #tpu.memory_space<vmem>>, vector<1x128xf32>
    %22 = vector.broadcast %21 : vector<1x128xf32> to vector<256x128xf32>
    %23 = arith.addf %20, %22 : vector<256x128xf32>
    %24 = math.tanh %23 : vector<256x128xf32>
    %c0_20 = arith.constant 0 : index
    %c0_21 = arith.constant 0 : index
    %25 = vector.load %arg10[%c0_20, %c0_21] : memref<128x128xf32, #tpu.memory_space<vmem>>, vector<128x128xf32>
    %cst_22 = arith.constant dense<0.000000e+00> : vector<256x128xf32>
    %26 = tpu.matmul %24, %25, %cst_22 {dimension_numbers = #tpu.dot_dimension_numbers<[1], [0], [0], [1], [0, 0, 1, 1], [], []>} : vector<256x128xf32>, vector<128x128xf32>, vector<256x128xf32> -> vector<256x128xf32>
    %c0_23 = arith.constant 0 : index
    %c0_24 = arith.constant 0 : index
    %27 = vector.load %arg11[%c0_23, %c0_24] : memref<1x128xf32, #tpu.memory_space<vmem>>, vector<1x128xf32>
    %28 = vector.broadcast %27 : vector<1x128xf32> to vector<256x128xf32>
    %29 = arith.addf %26, %28 : vector<256x128xf32>
    %30 = math.tanh %29 : vector<256x128xf32>
    %c0_25 = arith.constant 0 : index
    %c0_26 = arith.constant 0 : index
    %31 = vector.load %arg12[%c0_25, %c0_26] : memref<128x128xf32, #tpu.memory_space<vmem>>, vector<128x128xf32>
    %cst_27 = arith.constant dense<0.000000e+00> : vector<256x128xf32>
    %32 = tpu.matmul %30, %31, %cst_27 {dimension_numbers = #tpu.dot_dimension_numbers<[1], [0], [0], [1], [0, 0, 1, 1], [], []>} : vector<256x128xf32>, vector<128x128xf32>, vector<256x128xf32> -> vector<256x128xf32>
    %c0_28 = arith.constant 0 : index
    %c0_29 = arith.constant 0 : index
    %33 = vector.load %arg13[%c0_28, %c0_29] : memref<1x128xf32, #tpu.memory_space<vmem>>, vector<1x128xf32>
    %34 = vector.broadcast %33 : vector<1x128xf32> to vector<256x128xf32>
    %35 = arith.addf %32, %34 : vector<256x128xf32>
    %36 = math.tanh %35 : vector<256x128xf32>
    %c0_30 = arith.constant 0 : index
    %c0_31 = arith.constant 0 : index
    %37 = vector.load %arg14[%c0_30, %c0_31] : memref<128x128xf32, #tpu.memory_space<vmem>>, vector<128x128xf32>
    %cst_32 = arith.constant dense<0.000000e+00> : vector<256x128xf32>
    %38 = tpu.matmul %36, %37, %cst_32 {dimension_numbers = #tpu.dot_dimension_numbers<[1], [0], [0], [1], [0, 0, 1, 1], [], []>} : vector<256x128xf32>, vector<128x128xf32>, vector<256x128xf32> -> vector<256x128xf32>
    %c0_33 = arith.constant 0 : index
    %c0_34 = arith.constant 0 : index
    %39 = vector.load %arg15[%c0_33, %c0_34] : memref<1x128xf32, #tpu.memory_space<vmem>>, vector<1x128xf32>
    %40 = vector.broadcast %39 : vector<1x128xf32> to vector<256x128xf32>
    %41 = arith.addf %38, %40 : vector<256x128xf32>
    %c0_35 = arith.constant 0 : index
    %c0_36 = arith.constant 0 : index
    %42 = vector.load %arg16[%c0_35, %c0_36] : memref<256x128xf32, #tpu.memory_space<vmem>>, vector<256x128xf32>
    tpu.vector_store %arg16[%c0_35, %c0_36], %41 {strides = array<i32>} : memref<256x128xf32, #tpu.memory_space<vmem>>, vector<256x128xf32>,
    return
  }
  func.func @transform_0(%arg0: i32) -> (i32, i32) {
    %c0_i32 = arith.constant 0 : i32
    %c0_i32_0 = arith.constant 0 : i32
    return %arg0, %c0_i32 : i32, i32
  }
  func.func @transform_1(%arg0: i32) -> (i32, i32) {
    %c0_i32 = arith.constant 0 : i32
    %c0_i32_0 = arith.constant 0 : i32
    %c0_i32_1 = arith.constant 0 : i32
    return %c0_i32, %c0_i32_0 : i32, i32
  }
  func.func @transform_2(%arg0: i32) -> (i32, i32) {
    %c0_i32 = arith.constant 0 : i32
    %c0_i32_0 = arith.constant 0 : i32
    %c0_i32_1 = arith.constant 0 : i32
    return %c0_i32, %c0_i32_0 : i32, i32
  }
  func.func @transform_3(%arg0: i32) -> (i32, i32) {
    %c0_i32 = arith.constant 0 : i32
    %c0_i32_0 = arith.constant 0 : i32
    %c0_i32_1 = arith.constant 0 : i32
    return %c0_i32, %c0_i32_0 : i32, i32
  }
  func.func @transform_4(%arg0: i32) -> (i32, i32) {
    %c0_i32 = arith.constant 0 : i32
    %c0_i32_0 = arith.constant 0 : i32
    %c0_i32_1 = arith.constant 0 : i32
    return %c0_i32, %c0_i32_0 : i32, i32
  }
  func.func @transform_5(%arg0: i32) -> (i32, i32) {
    %c0_i32 = arith.constant 0 : i32
    %c0_i32_0 = arith.constant 0 : i32
    %c0_i32_1 = arith.constant 0 : i32
    return %c0_i32, %c0_i32_0 : i32, i32
  }
  func.func @transform_6(%arg0: i32) -> (i32, i32) {
    %c0_i32 = arith.constant 0 : i32
    %c0_i32_0 = arith.constant 0 : i32
    %c0_i32_1 = arith.constant 0 : i32
    return %c0_i32, %c0_i32_0 : i32, i32
  }
  func.func @transform_7(%arg0: i32) -> (i32, i32) {
    %c0_i32 = arith.constant 0 : i32
    %c0_i32_0 = arith.constant 0 : i32
    %c0_i32_1 = arith.constant 0 : i32
    return %c0_i32, %c0_i32_0 : i32, i32
  }
  func.func @transform_8(%arg0: i32) -> (i32, i32) {
    %c0_i32 = arith.constant 0 : i32
    %c0_i32_0 = arith.constant 0 : i32
    %c0_i32_1 = arith.constant 0 : i32
    return %c0_i32, %c0_i32_0 : i32, i32
  }
  func.func @transform_9(%arg0: i32) -> (i32, i32) {
    %c0_i32 = arith.constant 0 : i32
    %c0_i32_0 = arith.constant 0 : i32
    %c0_i32_1 = arith.constant 0 : i32
    return %c0_i32, %c0_i32_0 : i32, i32
  }
  func.func @transform_10(%arg0: i32) -> (i32, i32) {
    %c0_i32 = arith.constant 0 : i32
    %c0_i32_0 = arith.constant 0 : i32
    %c0_i32_1 = arith.constant 0 : i32
    return %c0_i32, %c0_i32_0 : i32, i32
  }
  func.func @transform_11(%arg0: i32) -> (i32, i32) {
    %c0_i32 = arith.constant 0 : i32
    %c0_i32_0 = arith.constant 0 : i32
    %c0_i32_1 = arith.constant 0 : i32
    return %c0_i32, %c0_i32_0 : i32, i32
  }
  func.func @transform_12(%arg0: i32) -> (i32, i32) {
    %c0_i32 = arith.constant 0 : i32
    %c0_i32_0 = arith.constant 0 : i32
    %c0_i32_1 = arith.constant 0 : i32
    return %c0_i32, %c0_i32_0 : i32, i32
  }
  func.func @transform_13(%arg0: i32) -> (i32, i32) {
    %c0_i32 = arith.constant 0 : i32
    %c0_i32_0 = arith.constant 0 : i32
    %c0_i32_1 = arith.constant 0 : i32
    return %c0_i32, %c0_i32_0 : i32, i32
  }
  func.func @transform_14(%arg0: i32) -> (i32, i32) {
    %c0_i32 = arith.constant 0 : i32
    %c0_i32_0 = arith.constant 0 : i32
    %c0_i32_1 = arith.constant 0 : i32
    return %c0_i32, %c0_i32_0 : i32, i32
  }
  func.func @transform_15(%arg0: i32) -> (i32, i32) {
    %c0_i32 = arith.constant 0 : i32
    %c0_i32_0 = arith.constant 0 : i32
    return %arg0, %c0_i32 : i32, i32
  }
}

</mosaic_0001>

<bundles_post_ra>
// kernel: tpu_custom_call.1
= control target key start
LH: loop header
LB: loop body
LE: loop exit
PB: predicated region body
PF: predicated region fallthrough
CT: control target
= control target key end

     0   :  { %s5235_s0 = inlined_call_operand.hbm [shape: f32[512,128], index: 0, kind: input, shape index: {}]   ;;  %s5236_s1 = inlined_call_operand.hbm [shape: f32[128,128], index: 1, kind: input, shape index: {}]   ;;  %s5237_s2 = inlined_call_operand.vmem [shape: f32[1,128], index: 2, kind: input, shape index: {}]   ;;  %s5238_s3 = inlined_call_operand.hbm [shape: f32[128,128], index: 3, kind: input, shape index: {}]   ;;  %s5239_s4 = inlined_call_operand.vmem [shape: f32[1,128], index: 4, kind: input, shape index: {}]   ;;  %s5240_s5 = inlined_call_operand.hbm [shape: f32[128,128], index: 5, kind: input, shape index: {}]   ;;  %s5241_s6 = inlined_call_operand.vmem [shape: f32[1,128], index: 6, kind: input, shape index: {}]   ;;  %s5242_s7 = inlined_call_operand.hbm [shape: f32[128,128], index: 7, kind: input, shape index: {}]   ;;  %s5243_s8 = inlined_call_operand.vmem [shape: f32[1,128], index: 8, kind: input, shape index: {}]   ;;  %s5244_s9 = inlined_call_operand.hbm [shape: f32[128,128], index: 9, kind: input, shape index: {}]   ;;  %s5245_s10 = inlined_call_operand.vmem [shape: f32[1,128], index: 10, kind: input, shape index: {}]   ;;  %s5246_s11 = inlined_call_operand.hbm [shape: f32[128,128], index: 11, kind: input, shape index: {}]   ;;  %s5247_s12 = inlined_call_operand.vmem [shape: f32[1,128], index: 12, kind: input, shape index: {}]   ;;  %s5248_s13 = inlined_call_operand.hbm [shape: f32[128,128], index: 13, kind: input, shape index: {}]   ;;  %s5249_s14 = inlined_call_operand.vmem [shape: f32[1,128], index: 14, kind: input, shape index: {}]   ;;  %s5250_s15 = inlined_call_operand.hbm [shape: f32[512,128], index: 15, kind: output, shape index: {}]  }
   0x1   :  { %5258 = sst [smem:[#allocation23_spill]] %s5236_s1 }
   0x2   :  { %5259 = sst [smem:[#allocation24_spill]] %s5238_s3 }
   0x3   :  { %5260 = sst [smem:[#allocation25_spill]] %s5240_s5 }
   0x4   :  { %5261 = sst [smem:[#allocation26_spill]] %s5242_s7 }
   0x5   :  { %5262 = sst [smem:[#allocation27_spill]] %s5244_s9 }
   0x6   :  { %5263 = sst [smem:[#allocation28_spill]] %s5246_s11 }
   0x7   :  { %5264 = sst [smem:[#allocation29_spill]] %s5248_s13 }
   0x8   :  { %5265 = sst [smem:[#allocation30_spill]] %s5249_s14 }
   0x9   :  { %5266 = sst [smem:[#allocation31_spill]] %s5250_s15 }
   0xa   :  { %20 = vsyncpa [#allocation3], 0 }
   0xb   :  { %22 = vsyncpa [#allocation3 + $0x1], 0 }
   0xc   :  { %23 = vsyncpa [#allocation6], 0 }
   0xd   :  { %24 = vsyncpa [#allocation9], 0 }
   0xe   :  { %25 = vsyncpa [#allocation12], 0 }
   0xf   :  { %26 = vsyncpa [#allocation15], 0 }
  0x10   :  { %27 = vsyncpa [#allocation4], 0 }
  0x11   :  { %29 = vsyncpa [#allocation4 + $0x1], 0  ;;  %s4618_s18 = smov 0   ;;  %s4620_s19 = smov 0  }
  0x12   :  { %s4622_s20 = smov 0   ;;  %s4624_s21 = smov 0  }
  0x13 LB: > { %s4525_s22 = smov [#allocation5]   ;;  %s4639_s24 = sadd.s32 4294967295, %s4523_s21   ;;  %s4523_s21 = sphi %s4624_s21, %s5301_s21   ;;  %s4519_s20 = sphi %s4622_s20, %s5300_s20   ;;  %s4515_s19 = sphi %s4620_s19, %s5299_s19   ;;  %s4511_s18 = sphi %s4618_s18, %s5298_s18  }
  0x14   : > { %s398_s23 = sshll.u32 %s4525_s22, 4  ;;  %p2764_p0 = scmp.ge.s32.totalorder %s4523_s21, 1  ;;  %s399_s23 = int_to_ptr.vmem [resolvable:$true] %s398_s23 }
  0x15   : > { %p5254_p1 = scmp.eq.s32.totalorder %s4639_s24, 0  ;;  %p386_p2 = scmp.lt.s32.totalorder %s4523_s21, 3 }
  0x16   : > { %s4526_s26 = smov [#allocation8]   ;;  %s4527_s29 = smov [#allocation11]  }
  0x17   : > { %p4644_p3 = pnand %p2764_p0, %p386_p2  ;;  %s430_s27 = sshll.u32 %s4526_s26, 4  ;;  %s4657_s27 = int_to_ptr.vmem [resolvable:$true] %s430_s27 }
  0x18   : > { %s462_s30 = sshll.u32 %s4527_s29, 4  ;;  %s4244_s17 = scalar_lea.vmem %s399_s23, 2048  ;;  %s4659_s30 = int_to_ptr.vmem [resolvable:$true] %s462_s30 }
  0x19   : > { %s5267_s25 = scalar_select %p4644_p3, 1, 0 }
  0x1a   : > { %p3760_p5 = pneg %p4644_p3  ;;  %p4245_p8 = scmp.ne.s32.totalorder %s399_s23, %s4244_s17 }
  0x1b   : > { %p4252_p11 = scmp.lt.s32.totalorder %s399_s23, %s399_s23  ;;  %p4253_p12 = scmp.lt.s32.totalorder %s4244_s17, %s4244_s17 }
  0x1c   : > { %p4653_p6 = pnand %p3760_p5, %p5254_p1 }
  0x1d   : > { %p4254_p13 = por %p4253_p12, %p4252_p11 }
  0x1e   : > { %p4663_p7 = pneg %p4653_p6 }
  0x20   : > { %p4247_p9 = pnand %p4245_p8, %p4663_p7 }
  0x22   : > { %p4248_p10 = pneg %p4247_p9 }
  0x24   : > { %p4255_p0 = pnand %p4254_p13, %p4248_p10 }
  0x26   : > { %4258 = shalt.err (!%p4255_p0)
}
  0x27   : > { %s5252_s22 = smov 128   ;;  %s5253_s26 = smov 8  }
  0x28   : > { %s5270_s1 = sld [smem:[#allocation23_spill]]  ;;  %s4270_s14 = scalar_lea.vmem %s4657_s27, 2048 }
  0x29   : > { %p4271_p2 = scmp.ne.s32.totalorder %s4657_s27, %s4270_s14  ;;  %p4278_p9 = scmp.lt.s32.totalorder %s4657_s27, %s4657_s27 }
  0x2a   : > { %p4279_p10 = scmp.lt.s32.totalorder %s4270_s14, %s4270_s14 }
  0x2b   : > { %p4273_p5 = pnand %p4271_p2, %p4663_p7 }
  0x2c   : > { %p4280_p11 = por %p4279_p10, %p4278_p9 }
  0x2d   : > { %p4274_p8 = pneg %p4273_p5 }
  0x2e   : > { %3763 = dma.hbm_to_vmem [thread:$0]  (!%p4653_p6), %s5270_s1, 2048, %s399_s23, [#allocation6], %s5252_s22, %s5252_s22, %s5253_s26  }
  0x2f   : > { %p4281_p12 = pnand %p4280_p11, %p4274_p8 }
  0x31   : > { %4284 = shalt.err (!%p4281_p12)
}
  0x32   : > { %s5271_s5 = sld [smem:[#allocation25_spill]]  ;;  %s4296_s23 = scalar_lea.vmem %s4659_s30, 2048 }
  0x33   : > { %p4297_p13 = scmp.ne.s32.totalorder %s4659_s30, %s4296_s23  ;;  %p4304_p5 = scmp.lt.s32.totalorder %s4659_s30, %s4659_s30 }
  0x34   : > { %p4305_p8 = scmp.lt.s32.totalorder %s4296_s23, %s4296_s23 }
  0x35   : > { %p4299_p0 = pnand %p4297_p13, %p4663_p7 }
  0x36   : > { %p4306_p9 = por %p4305_p8, %p4304_p5 }
  0x37   : > { %p4300_p2 = pneg %p4299_p0 }
  0x38   : > { %3769 = dma.hbm_to_vmem [thread:$0]  (!%p4653_p6), %s5271_s5, 2048, %s4657_s27, [#allocation9], %s5252_s22, %s5252_s22, %s5253_s26  }
  0x39   : > { %p4307_p10 = pnand %p4306_p9, %p4300_p2 }
  0x3b   : > { %4310 = shalt.err (!%p4307_p10)
}
  0x3c   : > { %s5272_s9 = sld [smem:[#allocation27_spill]]  ;;  %s4530_s27 = smov [#allocation7]  }
  0x3d   : > { %s414_s17 = sshll.u32 %s4530_s27, 4  ;;  %s4531_s15 = smov [#allocation10]   ;;  %s415_s17 = int_to_ptr.vmem [resolvable:$true] %s414_s17 }
  0x3e   : > { %s446_s1 = sshll.u32 %s4531_s15, 4  ;;  %s4322_s23 = scalar_lea.vmem %s415_s17, 2048  ;;  %s447_s1 = int_to_ptr.vmem [resolvable:$true] %s446_s1 }
  0x3f   : > { %p4323_p11 = scmp.ne.s32.totalorder %s415_s17, %s4322_s23  ;;  %p4330_p0 = scmp.lt.s32.totalorder %s415_s17, %s415_s17 }
  0x40   : > { %p4331_p2 = scmp.lt.s32.totalorder %s4322_s23, %s4322_s23 }
  0x41   : > { %p4325_p12 = pnand %p4323_p11, %p4663_p7 }
  0x42   : > { %3775 = dma.hbm_to_vmem [thread:$0]  (!%p4653_p6), %s5272_s9, 2048, %s4659_s30, [#allocation12], %s5252_s22, %s5252_s22, %s5253_s26  }
  0x43   : > { %p4326_p13 = pneg %p4325_p12  ;;  %p4332_p5 = por %p4331_p2, %p4330_p0 }
  0x45   : > { %p4333_p8 = pnand %p4332_p5, %p4326_p13 }
  0x47   : > { %4336 = shalt.err (!%p4333_p8)
}
  0x48   : > { %s5273_s3 = sld [smem:[#allocation24_spill]]  ;;  %s4348_s29 = scalar_lea.vmem %s447_s1, 2048 }
  0x49   : > { %p4349_p9 = scmp.ne.s32.totalorder %s447_s1, %s4348_s29  ;;  %p4356_p12 = scmp.lt.s32.totalorder %s447_s1, %s447_s1 }
  0x4a   : > { %p4357_p0 = scmp.lt.s32.totalorder %s4348_s29, %s4348_s29 }
  0x4b   : > { %p4351_p10 = pnand %p4349_p9, %p4663_p7 }
  0x4c   : > { %p4358_p13 = por %p4357_p0, %p4356_p12 }
  0x4d   : > { %p4352_p11 = pneg %p4351_p10 }
  0x4e   : > { %3766 = dma.hbm_to_vmem [thread:$0]  (!%p4653_p6), %s5273_s3, 2048, %s415_s17, [#allocation6], %s5252_s22, %s5252_s22, %s5253_s26  }
  0x4f   : > { %p4359_p2 = pnand %p4358_p13, %p4352_p11 }
  0x51   : > { %4362 = shalt.err (!%p4359_p2)
}
  0x52   : > { %s5274_s7 = sld [smem:[#allocation26_spill]]  ;;  %s4532_s17 = smov [#allocation13]  }
  0x53   : > { %s478_s23 = sshll.u32 %s4532_s17, 4  ;;  %s4533_s30 = smov [#allocation14]   ;;  %s479_s23 = int_to_ptr.vmem [resolvable:$true] %s478_s23 }
  0x54   : > { %s494_s14 = sshll.u32 %s4533_s30, 4  ;;  %s4374_s3 = scalar_lea.vmem %s479_s23, 2048  ;;  %s495_s14 = int_to_ptr.vmem [resolvable:$true] %s494_s14 }
  0x55   : > { %p4375_p5 = scmp.ne.s32.totalorder %s479_s23, %s4374_s3  ;;  %p4382_p10 = scmp.lt.s32.totalorder %s479_s23, %s479_s23 }
  0x56   : > { %p4383_p11 = scmp.lt.s32.totalorder %s4374_s3, %s4374_s3 }
  0x57   : > { %p4377_p8 = pnand %p4375_p5, %p4663_p7 }
  0x58   : > { %3772 = dma.hbm_to_vmem [thread:$0]  (!%p4653_p6), %s5274_s7, 2048, %s447_s1, [#allocation9], %s5252_s22, %s5252_s22, %s5253_s26  }
  0x59   : > { %p4378_p9 = pneg %p4377_p8  ;;  %p4384_p12 = por %p4383_p11, %p4382_p10 }
  0x5b   : > { %p4385_p0 = pnand %p4384_p12, %p4378_p9 }
  0x5d   : > { %4388 = shalt.err (!%p4385_p0)
}
  0x5e   : > { %s5275_s11 = sld [smem:[#allocation28_spill]]  ;;  %s4400_s27 = scalar_lea.vmem %s495_s14, 2048 }
  0x5f   : > { %p4401_p13 = scmp.ne.s32.totalorder %s495_s14, %s4400_s27  ;;  %p4408_p8 = scmp.lt.s32.totalorder %s495_s14, %s495_s14 }
  0x60   : > { %p4409_p10 = scmp.lt.s32.totalorder %s4400_s27, %s4400_s27 }
  0x61   : > { %p4403_p2 = pnand %p4401_p13, %p4663_p7 }
  0x62   : > { %p4410_p9 = por %p4409_p10, %p4408_p8 }
  0x63   : > { %p4404_p5 = pneg %p4403_p2 }
  0x64   : > { %3778 = dma.hbm_to_vmem [thread:$0]  (!%p4653_p6), %s5275_s11, 2048, %s479_s23, [#allocation12], %s5252_s22, %s5252_s22, %s5253_s26  }
  0x65   : > { %p4411_p11 = pnand %p4410_p9, %p4404_p5 }
  0x67   : > { %4414 = shalt.err (!%p4411_p11)
}
  0x68   : > { %s5276_s13 = sld [smem:[#allocation29_spill]]  ;;  %s2763_s28 = sadd.s32 4294967294, %s4523_s21  }
  0x69   : > { %s4749_s16 = sadd.s32 1, %s4523_s21   ;;  %s42_s17 = sadd.s32 1, %s4519_s20 }
  0x6a   : > { %s39_s23 = ssub.s32 %s4523_s21, %s4749_s16  ;;  %p49_p7 = scmp.ne.s32.totalorder %s4519_s20, %s4515_s19 }
  0x6b   : > { %p40_p12 = scmp.eq.s32.totalorder %s39_s23, 0  ;;  %p50_p0 = scmp.eq.s32.totalorder %s4523_s21, 0 }
  0x6c   : > { %p55_p13 = scmp.ne.s32.totalorder %s4515_s19, %s4511_s18  ;;  %p373_p2 = scmp.eq.s32.totalorder %s4639_s24, 1 }
  0x6d   : > { %s4761_s30 = scalar_select %p40_p12, %s4519_s20, %s42_s17  }
  0x6e   : > { %3781 = dma.hbm_to_vmem [thread:$0]  (!%p4653_p6), %s5276_s13, 2048, %s495_s14, [#allocation15], %s5252_s22, %s5252_s22, %s5253_s26  }
  0x6f   : > { %p51_p5 = por %p50_p0, %p49_p7  ;;  %p4765_p8 = por %p5254_p1, %p55_p13 }
  0x70   : > { %p4769_p6 = por %p373_p2, %p49_p7  ;;  %p379_p10 = scmp.eq.s32.totalorder %s2763_s28, 1 }
  0x71   : > { %s5277_s1 = scalar_select %p4765_p8, 1, 0 }
  0x72   : > { %s5278_s14 = scalar_select %p4769_p6, 1, 0 }
  0x73   : > { %p3797_p9 = scmp.lt.s32.totalorder %s4523_s21, 2  ;;  %s511_s29 = sand.u32 1, %s4519_s20  }
  0x74   : > { %p4775_p11 = por %p379_p10, %p55_p13  ;;  %s2773_s3 = sshll.u32 %s511_s29, 8 }
  0x75   : > { %s2798_s15 = sshll.u32 %s4523_s21, 12  ;;  %s515_s26 = scalar_lea.vmem [#allocation2], %s2773_s3 }
  0x76   : > { %s5279_s27 = scalar_select %p4775_p11, 1, 0 }
  0x77   : > { %s4783_s22 = scalar_lea.hbm %s5235_s0, %s2798_s15  ;;  %s522_s5 = sshll.u32 %s515_s26, 4  ;;  %s4789_s5 = int_to_ptr.vmem [resolvable:$true] %s522_s5 }
  0x78   : > { %p4785_p7 = pnand %p3797_p9, %p51_p5  ;;  %s4791_s7 = scalar_lea.sflag [#allocation3], %s511_s29 }
  0x79   : > { %s4415_s9 = scalar_lea.hbm %s4783_s22, 4096  ;;  %s4420_s3 = scalar_lea.hbm %s5235_s0, 8192 }
  0x7a   : > { %p4416_p12 = scmp.ne.s32.totalorder %s4783_s22, %s4415_s9  ;;  %p4417_p0 = pneg %p4785_p7 }
  0x7b   : > { %p4421_p5 = scmp.lt.s32.totalorder %s4783_s22, %s5235_s0  ;;  %p4422_p10 = scmp.lt.s32.totalorder %s4420_s3, %s4415_s9 }
  0x7c   : > { %p4418_p13 = pnand %p4417_p0, %p4416_p12 }
  0x7d   : > { %p4423_p9 = por %p4422_p10, %p4421_p5 }
  0x7e   : > { %p4419_p2 = pneg %p4418_p13 }
  0x80   : > { %p4424_p4 = pnand %p4423_p9, %p4419_p2 }
  0x82   : > { %4427 = shalt.err (!%p4424_p4)
}
  0x83   : > { %s4428_s29 = scalar_lea.vmem %s4789_s5, 4096  ;;  %s4534_s11 = smov [#allocation2]  }
  0x84   : > { %p4429_p1 = scmp.ne.s32.totalorder %s4789_s5, %s4428_s29  ;;  %s4433_s13 = sshll.u32 %s4534_s11, 4  ;;  %s4434_s13 = int_to_ptr.vmem [resolvable:$false] %s4433_s13 }
  0x85   : > { %s4435_s15 = scalar_lea.vmem %s4434_s13, 8192  ;;  %p4436_p13 = scmp.lt.s32.totalorder %s4789_s5, %s4434_s13 }
  0x86   : > { %p4431_p11 = pnand %p4429_p1, %p4417_p0  ;;  %p4437_p6 = scmp.lt.s32.totalorder %s4435_s15, %s4428_s29 }
  0x88   : > { %p4432_p12 = pneg %p4431_p11  ;;  %p4438_p8 = por %p4437_p6, %p4436_p13 }
  0x8a   : > { %p4439_p3 = pnand %p4438_p8, %p4432_p12 }
  0x8c   : > { %4442 = shalt.err (!%p4439_p3)
}
  0x8d   : > { %s5281_s9 = smov 8   ;;  %s5282_s17 = smov 128  }
  0x8e   : > { %3785 = dma.hbm_to_vmem [thread:$0]  (!%p4785_p7), %s4783_s22, 4096, %s4789_s5, %s4791_s7, %s5282_s17, %s5282_s17, %s5281_s9  }
  0x8f   : > { %p5283_p1 = scmp.ne.s32.totalorder %s5267_s25, 0 }
  0x90   : > { %s4818_s11 = sand.u32 (!%p5283_p1), 1, %s4515_s19   ;;  %p5284_p3 = scmp.ne.s32.totalorder (!%p5283_p1), %s5277_s1, 0 }
  0x91   : > { %534 = sbr.rel (%p5283_p1) target bundleno = 1740 (0x6cc), region = 80  ;;  %s2777_s13 = sshll.u32 (!%p5283_p1), %s4818_s11, 8 }
  0x92   : > { %s537_s3 = scalar_lea.sflag (!%p5283_p1), [#allocation3], %s4818_s11  ;;  %s4824_s28 = scalar_lea.vmem (!%p5283_p1), [#allocation2], %s2777_s13 }
  0x96   : > { %4486 = dma.done.wait (%p5284_p3), %s537_s3, 4096  }
  0x97   : > { %4488 = vsyncadd (%p5284_p3), %s537_s3, 4294963200  ;;  %p5285_p4 = scmp.eq.s32.totalorder %s4639_s24, 0 }
  0x99   : > { %4490 = dma.done.wait (%p5285_p4), [#allocation6], 4096   ;;  %p5286_p8 = pmov %p5285_p4 }
  0x9a   : > { %p5287_p6 = pmov %p5285_p4 }
  0x9b   : > { %4492 = vsyncadd (%p5286_p8), [#allocation6], 4294963200 }
  0x9c   : > { %4494 = dma.done.wait (%p5287_p6), [#allocation9], 4096   ;;  %p5288_p11 = pmov %p5285_p4 }
  0x9d   : > { %p5289_p7 = pmov %p5285_p4 }
  0x9e   : > { %4496 = vsyncadd (%p5288_p11), [#allocation9], 4294963200 }
  0x9f   : > { %4498 = dma.done.wait (%p5289_p7), [#allocation12], 4096   ;;  %p5290_p0 = pmov %p5285_p4 }
  0xa1   : > { %4500 = vsyncadd (%p5290_p0), [#allocation12], 4294963200  ;;  %p5291_p2 = pmov %p5290_p0 }
  0xa2   : > { %p5292_p5 = pmov %p5290_p0 }
  0xa3   : > { %4502 = dma.done.wait (%p5291_p2), [#allocation15], 2048  }
  0xa4   : > { %4504 = vsyncadd (%p5292_p5), [#allocation15], 4294965248  ;;  %v664_v0 = vld [vmem:[#allocation5 + $0x78] sm:$0xff]  ;;  %v663_v1 = vld [vmem:[#allocation5 + $0x70] sm:$0xff]  ;;  %s5293_s7 = sld [smem:[#allocation30_spill]]  ;;  %s5120_s25 = scalar_lea.vmem [#allocation16], %s2777_s13 }
  0xa5   : > { %3136 = vmatprep.subr.mxu0 %v664_v0  ;;  %3696 = vmatprep.subr.mxu1 %v664_v0  ;;  %v662_v2 = vld [vmem:[#allocation5 + $0x68] sm:$0xff]  ;;  %v661_v3 = vld [vmem:[#allocation5 + $0x60] sm:$0xff]  ;;  %v660_v5 = vld [vmem:[#allocation5 + $0x58] sm:$0xff]  ;;  %s2799_s13 = sshll.u32 %s4639_s24, 12  ;;  %s2623_s22 = sshll.u32 %s5120_s25, 4  ;;  %s5189_s22 = int_to_ptr.vmem [resolvable:$true] %s2623_s22 }
  0xa6   : > { %3137 = vmatpush3.msra.mxu0 %v664_v0  ;;  %3712 = vmatpush3.msra.mxu1 %v664_v0  ;;  %v617_v4 = vld [vmem:[%s4824_s28] sm:$0xff]  ;;  %v659_v6 = vld [vmem:[#allocation5 + $0x50] sm:$0xff]  ;;  %v658_v7 = vld [vmem:[#allocation5 + $0x48] sm:$0xff]  ;;  %s5294_s23 = sld [smem:[#allocation31_spill]]  ;;  %s2610_s24 = scalar_lea.sflag [#allocation4], %s4818_s11 }
  0xa7   : > { %3138 = vmatprep.subr.mxu0 %v663_v1  ;;  %3697 = vmatprep.subr.mxu1 %v663_v1  ;;  %v657_v8 = vld [vmem:[#allocation5 + $0x40] sm:$0xff]  ;;  %v656_v9 = vld [vmem:[#allocation5 + $0x38] sm:$0xff]  ;;  %v655_v10 = vld [vmem:[#allocation5 + $0x30] sm:$0xff]  ;;  %s4443_s15 = scalar_lea.vmem %s5189_s22, 4096  ;;  %p5295_p9 = scmp.ne.s32.totalorder %s5278_s14, 0 }
  0xa8   : > { %3139 = vmatpush3.msra.mxu0 %v663_v1  ;;  %3713 = vmatpush3.msra.mxu1 %v663_v1  ;;  %v654_v11 = vld [vmem:[#allocation5 + $0x28] sm:$0xff]  ;;  %v653_v12 = vld [vmem:[#allocation5 + $0x20] sm:$0xff]  ;;  %v652_v13 = vld [vmem:[#allocation5 + $0x18] sm:$0xff]  ;;  %p4444_p10 = scmp.ne.s32.totalorder %s5189_s22, %s4443_s15  ;;  %s4535_s9 = smov [#allocation16]  }
  0xa9   : > { %3140 = vmatprep.subr.mxu0 %v662_v2  ;;  %3698 = vmatprep.subr.mxu1 %v662_v2  ;;  %v651_v14 = vld [vmem:[#allocation5 + $0x10] sm:$0xff]  ;;  %v650_v15 = vld [vmem:[#allocation5 + $0x8] sm:$0xff]  ;;  %v649_v16 = vld [vmem:[#allocation5] sm:$0xff]  ;;  %s4447_s17 = sshll.u32 %s4535_s9, 4  ;;  %s4448_s17 = int_to_ptr.vmem [resolvable:$false] %s4447_s17 }
  0xaa   : > { %3141 = vmatpush3.msra.mxu0 %v662_v2  ;;  %3168 = vmatprep.mubr.f32.mxu0 %v617_v4  ;;  %v618_v17 = vld [vmem:[%s4824_s28 + $0x8] sm:$0xff]  ;;  %v619_v18 = vld [vmem:[%s4824_s28 + $0x10] sm:$0xff]  ;;  %v633_v19 = vld [vmem:[%s4824_s28 + $0x80] sm:$0xff]  ;;  %p4445_p12 = pnand %p4444_p10, %p5295_p9  ;;  %s4449_s3 = scalar_lea.vmem %s4448_s17, 8192 }
  0xab   : > { %3142 = vmatprep.subr.mxu0 %v661_v3  ;;  %3714 = vmatpush3.msra.mxu1 %v662_v2  ;;  %v634_v20 = vld [vmem:[%s4824_s28 + $0x88] sm:$0xff]  ;;  %v944_v21 = vld [vmem:[#allocation7 + $0x78] sm:$0xff]  ;;  %v635_v22 = vld [vmem:[%s4824_s28 + $0x90] sm:$0xff]  ;;  %p4450_p1 = scmp.lt.s32.totalorder %s5189_s22, %s4448_s17  ;;  %p4451_p3 = scmp.lt.s32.totalorder %s4449_s3, %s4443_s15 }
  0xac   : > { %3143 = vmatpush3.msra.mxu0 %v661_v3  ;;  %3699 = vmatprep.subr.mxu1 %v661_v3  ;;  %v620_v23 = vld [vmem:[%s4824_s28 + $0x18] sm:$0xff]  ;;  %v943_v24 = vld [vmem:[#allocation7 + $0x70] sm:$0xff]  ;;  %v621_v25 = vld [vmem:[%s4824_s28 + $0x20] sm:$0xff]  ;;  %s5187_s29 = scalar_lea.hbm %s5294_s23, %s2799_s13  ;;  %p4446_p13 = pneg %p4445_p12 }
  0xad   : > { %3144 = vmatprep.subr.mxu0 %v660_v5  ;;  %3715 = vmatpush3.msra.mxu1 %v661_v3  ;;  %v636_v26 = vld [vmem:[%s4824_s28 + $0x98] sm:$0xff]  ;;  %v942_v27 = vld [vmem:[#allocation7 + $0x68] sm:$0xff]  ;;  %v637_v28 = vld [vmem:[%s4824_s28 + $0xa0] sm:$0xff]  ;;  %p4452_p4 = por %p4451_p3, %p4450_p1 }
  0xae   : > { %3145 = vmatpush3.msra.mxu0 %v660_v5  ;;  %3700 = vmatprep.subr.mxu1 %v660_v5  ;;  %v622_v29 = vld [vmem:[%s4824_s28 + $0x28] sm:$0xff]  ;;  %v941_v30 = vld [vmem:[#allocation7 + $0x60] sm:$0xff]  ;;  %v623_v31 = vld [vmem:[%s4824_s28 + $0x30] sm:$0xff] }
  0xaf   : > { %3146 = vmatprep.subr.mxu0 %v659_v6  ;;  %3716 = vmatpush3.msra.mxu1 %v660_v5  ;;  %v638_v32 = vld [vmem:[%s4824_s28 + $0xa8] sm:$0xff]  ;;  %v940_v33 = vld [vmem:[#allocation7 + $0x58] sm:$0xff]  ;;  %v639_v34 = vld [vmem:[%s4824_s28 + $0xb0] sm:$0xff]  ;;  %p4453_p8 = pnand %p4452_p4, %p4446_p13 }
  0xb0   : > { %3147 = vmatpush3.msra.mxu0 %v659_v6  ;;  %3701 = vmatprep.subr.mxu1 %v659_v6  ;;  %v624_v35 = vld [vmem:[%s4824_s28 + $0x38] sm:$0xff]  ;;  %v939_v36 = vld [vmem:[#allocation7 + $0x50] sm:$0xff]  ;;  %v625_v37 = vld [vmem:[%s4824_s28 + $0x40] sm:$0xff] }
  0xb1   : > { %3148 = vmatprep.subr.mxu0 %v658_v7  ;;  %3717 = vmatpush3.msra.mxu1 %v659_v6  ;;  %v640_v38 = vld [vmem:[%s4824_s28 + $0xb8] sm:$0xff]  ;;  %v938_v39 = vld [vmem:[#allocation7 + $0x48] sm:$0xff]  ;;  %v641_v40 = vld [vmem:[%s4824_s28 + $0xc0] sm:$0xff] }
  0xb2   : > { %3149 = vmatpush3.msra.mxu0 %v658_v7  ;;  %3702 = vmatprep.subr.mxu1 %v658_v7  ;;  %v626_v41 = vld [vmem:[%s4824_s28 + $0x48] sm:$0xff]  ;;  %v627_v42 = vld [vmem:[%s4824_s28 + $0x50] sm:$0xff]  ;;  %v628_v45 = vld [vmem:[%s4824_s28 + $0x58] sm:$0xff] }
  0xb3   : > { %3150 = vmatprep.subr.mxu0 %v657_v8  ;;  %3718 = vmatpush3.msra.mxu1 %v658_v7  ;;  %v642_v43 = vld [vmem:[%s4824_s28 + $0xc8] sm:$0xff]  ;;  %v643_v44 = vld [vmem:[%s4824_s28 + $0xd0] sm:$0xff]  ;;  %v629_v46 = vld [vmem:[%s4824_s28 + $0x60] sm:$0xff] }
  0xb4   : > { %3151 = vmatpush3.msra.mxu0 %v657_v8  ;;  %3703 = vmatprep.subr.mxu1 %v657_v8  ;;  %v644_v47 = vld [vmem:[%s4824_s28 + $0xd8] sm:$0xff]  ;;  %v645_v48 = vld [vmem:[%s4824_s28 + $0xe0] sm:$0xff]  ;;  %v630_v49 = vld [vmem:[%s4824_s28 + $0x68] sm:$0xff] }
  0xb5   : > { %3152 = vmatprep.subr.mxu0 %v656_v9  ;;  %3719 = vmatpush3.msra.mxu1 %v657_v8  ;;  %v631_v50 = vld [vmem:[%s4824_s28 + $0x70] sm:$0xff]  ;;  %v646_v51 = vld [vmem:[%s4824_s28 + $0xe8] sm:$0xff]  ;;  %v632_v53 = vld [vmem:[%s4824_s28 + $0x78] sm:$0xff] }
  0xb6   : > { %3153 = vmatpush3.msra.mxu0 %v656_v9  ;;  %3704 = vmatprep.subr.mxu1 %v656_v9  ;;  %v647_v52 = vld [vmem:[%s4824_s28 + $0xf0] sm:$0xff]  ;;  %v648_v54 = vld [vmem:[%s4824_s28 + $0xf8] sm:$0xff]  ;;  %v937_v55 = vld [vmem:[#allocation7 + $0x40] sm:$0xff] }
  0xb7   : > { %3154 = vmatprep.subr.mxu0 %v655_v10  ;;  %3720 = vmatpush3.msra.mxu1 %v656_v9  ;;  %v936_v56 = vld [vmem:[#allocation7 + $0x38] sm:$0xff]  ;;  %v935_v57 = vld [vmem:[#allocation7 + $0x30] sm:$0xff]  ;;  %v934_v58 = vld [vmem:[#allocation7 + $0x28] sm:$0xff] }
  0xb8   : > { %3155 = vmatpush3.msra.mxu0 %v655_v10  ;;  %3705 = vmatprep.subr.mxu1 %v655_v10  ;;  %v933_v59 = vld [vmem:[#allocation7 + $0x20] sm:$0xff]  ;;  %v932_v60 = vld [vmem:[#allocation7 + $0x18] sm:$0xff]  ;;  %v931_v61 = vld [vmem:[#allocation7 + $0x10] sm:$0xff] }
  0xb9   : > { %3156 = vmatprep.subr.mxu0 %v654_v11  ;;  %3721 = vmatpush3.msra.mxu1 %v655_v10  ;;  %v930_v62 = vld [vmem:[#allocation7 + $0x8] sm:$0xff]  ;;  %v929_v63 = vld [vmem:[#allocation7] sm:$0xff]  ;;  %v1224_v0 = vld [vmem:[#allocation8 + $0x78] sm:$0xff] }
  0xba   : > { %3157 = vmatpush3.msra.mxu0 %v654_v11  ;;  %3706 = vmatprep.subr.mxu1 %v654_v11  ;;  %v1223_v1 = vld [vmem:[#allocation8 + $0x70] sm:$0xff]  ;;  %v1222_v2 = vld [vmem:[#allocation8 + $0x68] sm:$0xff]  ;;  %v1221_v3 = vld [vmem:[#allocation8 + $0x60] sm:$0xff] }
  0xbb   : > { %3158 = vmatprep.subr.mxu0 %v653_v12  ;;  %3722 = vmatpush3.msra.mxu1 %v654_v11  ;;  %v1220_v4 = vld [vmem:[#allocation8 + $0x58] sm:$0xff]  ;;  %v1219_v5 = vld [vmem:[#allocation8 + $0x50] sm:$0xff]  ;;  %v1218_v6 = vld [vmem:[#allocation8 + $0x48] sm:$0xff] }
  0xbc   : > { %3159 = vmatpush3.msra.mxu0 %v653_v12  ;;  %3707 = vmatprep.subr.mxu1 %v653_v12  ;;  %v4881_v7 = vld [vmem:[%s5237_s2] ss:$0 sm:$0xff] }
  0xbd   : > { %3160 = vmatprep.subr.mxu0 %v652_v13  ;;  %3723 = vmatpush3.msra.mxu1 %v653_v12 }
  0xbe   : > { %3161 = vmatpush3.msra.mxu0 %v652_v13  ;;  %3708 = vmatprep.subr.mxu1 %v652_v13 }
  0xbf   : > { %3162 = vmatprep.subr.mxu0 %v651_v14  ;;  %3724 = vmatpush3.msra.mxu1 %v652_v13 }
  0xc0   : > { %3163 = vmatpush3.msra.mxu0 %v651_v14  ;;  %3709 = vmatprep.subr.mxu1 %v651_v14 }
  0xc1   : > { %3164 = vmatprep.subr.mxu0 %v650_v15  ;;  %3725 = vmatpush3.msra.mxu1 %v651_v14 }
  0xc2   : > { %3165 = vmatpush3.msra.mxu0 %v650_v15  ;;  %3710 = vmatprep.subr.mxu1 %v650_v15 }
  0xc3   : > { %3166 = vmatprep.subr.mxu0 %v649_v16  ;;  %3726 = vmatpush3.msra.mxu1 %v650_v15 }
  0xc4   : > { %3167 = vmatpush3.msra.mxu0 %v649_v16  ;;  %3711 = vmatprep.subr.mxu1 %v649_v16 }
  0xc5   : > { %3169 = vmatmul.mubr.f32.vlgmr.msra.gmra.mxu0 %v618_v17  ;;  %3727 = vmatpush3.msra.mxu1 %v649_v16 }
  0xc6   : > { %3171 = vmatprep.mubr.f32.mxu0 %v619_v18  ;;  %3192 = vmatprep.mubr.f32.mxu1 %v633_v19 }
  0xc7   : > { %3193 = vmatmul.mubr.f32.vlgmr.msra.gmra.mxu1 %v634_v20  ;;  %3216 = vmatprep.subr.mxu1 %v944_v21 }
  0xc8   : > { %3195 = vmatprep.mubr.f32.mxu1 %v635_v22  ;;  %3217 = vmatpush3.msra.mxu1 %v944_v21 }
  0xc9   : > { %3172 = vmatmul.mubr.f32.gmra.mxu0 %v620_v23  ;;  %3218 = vmatprep.subr.mxu1 %v943_v24 }
  0xca   : > { %3174 = vmatprep.mubr.f32.mxu0 %v621_v25  ;;  %3219 = vmatpush3.msra.mxu1 %v943_v24 }
  0xcb   : > { %3196 = vmatmul.mubr.f32.gmra.mxu1 %v636_v26  ;;  %3220 = vmatprep.subr.mxu1 %v942_v27 }
  0xcc   : > { %3198 = vmatprep.mubr.f32.mxu1 %v637_v28  ;;  %3221 = vmatpush3.msra.mxu1 %v942_v27 }
  0xcd   : > { %3175 = vmatmul.mubr.f32.gmra.mxu0 %v622_v29  ;;  %3222 = vmatprep.subr.mxu1 %v941_v30 }
  0xce   : > { %3177 = vmatprep.mubr.f32.mxu0 %v623_v31  ;;  %3223 = vmatpush3.msra.mxu1 %v941_v30 }
  0xcf   : > { %3199 = vmatmul.mubr.f32.gmra.mxu1 %v638_v32  ;;  %3224 = vmatprep.subr.mxu1 %v940_v33 }
  0xd0   : > { %3201 = vmatprep.mubr.f32.mxu1 %v639_v34  ;;  %3225 = vmatpush3.msra.mxu1 %v940_v33 }
  0xd1   : > { %3178 = vmatmul.mubr.f32.gmra.mxu0 %v624_v35  ;;  %3226 = vmatprep.subr.mxu1 %v939_v36 }
  0xd2   : > { %3180 = vmatprep.mubr.f32.mxu0 %v625_v37  ;;  %3227 = vmatpush3.msra.mxu1 %v939_v36 }
  0xd3   : > { %3202 = vmatmul.mubr.f32.gmra.mxu1 %v640_v38  ;;  %3228 = vmatprep.subr.mxu1 %v938_v39 }
  0xd4   : > { %3204 = vmatprep.mubr.f32.mxu1 %v641_v40  ;;  %3229 = vmatpush3.msra.mxu1 %v938_v39 }
  0xd5   : > { %3181 = vmatmul.mubr.f32.gmra.mxu0 %v626_v41  ;;  %3230 = vmatprep.subr.mxu1 %v937_v55 }
  0xd6   : > { %3183 = vmatprep.mubr.f32.mxu0 %v627_v42  ;;  %3231 = vmatpush3.msra.mxu1 %v937_v55 }
  0xd7   : > { %3205 = vmatmul.mubr.f32.gmra.mxu1 %v642_v43  ;;  %3232 = vmatprep.subr.mxu1 %v936_v56 }
  0xd8   : > { %3207 = vmatprep.mubr.f32.mxu1 %v643_v44  ;;  %3233 = vmatpush3.msra.mxu1 %v936_v56 }
  0xd9   : > { %3184 = vmatmul.mubr.f32.gmra.mxu0 %v628_v45  ;;  %3234 = vmatprep.subr.mxu1 %v935_v57 }
  0xda   : > { %3186 = vmatprep.mubr.f32.mxu0 %v629_v46  ;;  %3235 = vmatpush3.msra.mxu1 %v935_v57 }
  0xdb   : > { %3208 = vmatmul.mubr.f32.gmra.mxu1 %v644_v47  ;;  %3236 = vmatprep.subr.mxu1 %v934_v58 }
  0xdc   : > { %3210 = vmatprep.mubr.f32.mxu1 %v645_v48  ;;  %3237 = vmatpush3.msra.mxu1 %v934_v58 }
  0xdd   : > { %3187 = vmatmul.mubr.f32.gmra.mxu0 %v630_v49  ;;  %3238 = vmatprep.subr.mxu1 %v933_v59 }
  0xde   : > { %3189 = vmatprep.mubr.f32.mxu0 %v631_v50  ;;  %3239 = vmatpush3.msra.mxu1 %v933_v59 }
  0xdf   : > { %3211 = vmatmul.mubr.f32.gmra.mxu1 %v646_v51  ;;  %3240 = vmatprep.subr.mxu1 %v932_v60 }
  0xe0   : > { %3213 = vmatprep.mubr.f32.mxu1 %v647_v52  ;;  %3241 = vmatpush3.msra.mxu1 %v932_v60 }
  0xe1   : > { %3190 = vmatmul.mubr.f32.gmra.mxu0 %v632_v53  ;;  %3242 = vmatprep.subr.mxu1 %v931_v61 }
  0xe2   : > { %3243 = vmatpush3.msra.mxu1 %v931_v61  ;;  %3296 = vmatprep.subr.mxu0 %v1224_v0 }
  0xe3   : > { %3214 = vmatmul.mubr.f32.gmra.mxu1 %v648_v54  ;;  %3244 = vmatprep.subr.mxu1 %v930_v62 }
  0xe4   : > { %3245 = vmatpush3.msra.mxu1 %v930_v62  ;;  %3297 = vmatpush3.msra.mxu0 %v1224_v0 }
  0xe5   : > { %3246 = vmatprep.subr.mxu1 %v929_v63  ;;  %3298 = vmatprep.subr.mxu0 %v1223_v1 }
  0xe6   : > { %3247 = vmatpush3.msra.mxu1 %v929_v63  ;;  %3299 = vmatpush3.msra.mxu0 %v1223_v1 }
  0xe7   : > { %3300 = vmatprep.subr.mxu0 %v1222_v2 }
  0xe8   : > { %3301 = vmatpush3.msra.mxu0 %v1222_v2 }
  0xe9   : > { %3302 = vmatprep.subr.mxu0 %v1221_v3 }
  0xea   : > { %3303 = vmatpush3.msra.mxu0 %v1221_v3 }
  0xeb   : > { %3304 = vmatprep.subr.mxu0 %v1220_v4 }
  0xec   : > { %3305 = vmatpush3.msra.mxu0 %v1220_v4 }
  0xed   : > { %3306 = vmatprep.subr.mxu0 %v1219_v5 }
  0xee   : > { %3307 = vmatpush3.msra.mxu0 %v1219_v5 }
  0xef   : > { %3308 = vmatprep.subr.mxu0 %v1218_v6 }
  0xf0   : > { %3309 = vmatpush3.msra.mxu0 %v1218_v6 }
 0x185   : > { %v3170_v8 = vpop.f32.mrf.mxu0 }
 0x186   : > { %v744_v9 = vadd.f32 %v3170_v8, %v4881_v7 }
 0x187   : > { %v738_v10 = vpop.f32.mrf.mxu0  ;;  %v4884_v11 = vpop.f32.mrf.mxu1 }
 0x188   : > { %v739_v12 = vadd.f32 %v4881_v7, %v738_v10  ;;  %v824_v61 = vadd.f32 %v4884_v11, %v4881_v7 }
 0x189   : > { %v3173_v13 = vpop.f32.mrf.mxu0  ;;  %v818_v14 = vpop.f32.mrf.mxu1 }
 0x18a   : > { %3849 = vtanh.f32 %v739_v12  ;;  %v754_v15 = vadd.f32 %v3173_v13, %v4881_v7  ;;  %v819_v52 = vadd.f32 %v4881_v7, %v818_v14 }
 0x18b   : > { %3851 = vtanh.f32 %v744_v9  ;;  %v748_v16 = vpop.f32.mrf.mxu0  ;;  %v4888_v17 = vpop.f32.mrf.mxu1 }
 0x18c   : > { %v749_v18 = vadd.f32 %v4881_v7, %v748_v16  ;;  %v834_v2 = vadd.f32 %v4888_v17, %v4881_v7 }
 0x18d   : > { %v3176_v19 = vpop.f32.mrf.mxu0  ;;  %v828_v20 = vpop.f32.mrf.mxu1 }
 0x18e   : > { %3853 = vtanh.f32 %v749_v18  ;;  %v764_v21 = vadd.f32 %v3176_v19, %v4881_v7  ;;  %v829_v59 = vadd.f32 %v4881_v7, %v828_v20 }
 0x18f   : > { %3855 = vtanh.f32 %v754_v15  ;;  %v758_v22 = vpop.f32.mrf.mxu0  ;;  %v4892_v23 = vpop.f32.mrf.mxu1 }
 0x190   : > { %v759_v24 = vadd.f32 %v4881_v7, %v758_v22  ;;  %v844_v8 = vadd.f32 %v4892_v23, %v4881_v7 }
 0x191   : > { %v3179_v25 = vpop.f32.mrf.mxu0  ;;  %v838_v28 = vpop.f32.mrf.mxu1 }
 0x192   : > { %3857 = vtanh.f32 %v759_v24  ;;  %v774_v26 = vadd.f32 %v3179_v25, %v4881_v7  ;;  %v839_v0 = vadd.f32 %v4881_v7, %v838_v28 }
 0x193   : > { %3859 = vtanh.f32 %v764_v21  ;;  %v768_v27 = vpop.f32.mrf.mxu0  ;;  %v4898_v34 = vpop.f32.mrf.mxu1 }
 0x194   : > { %v769_v29 = vadd.f32 %v4881_v7, %v768_v27  ;;  %v854_v14 = vadd.f32 %v4898_v34, %v4881_v7 }
 0x195   : > { %v3182_v30 = vpop.f32.mrf.mxu0  ;;  %v848_v41 = vpop.f32.mrf.mxu1 }
 0x196   : > { %3861 = vtanh.f32 %v769_v29  ;;  %v784_v32 = vadd.f32 %v3182_v30, %v4881_v7  ;;  %v849_v5 = vadd.f32 %v4881_v7, %v848_v41  ;;  %v1217_v41 = vld [vmem:[#allocation8 + $0x40] sm:$0xff] }
 0x197   : > { %v3850_v31 = vpop.eup %3849  ;;  %3863 = vtanh.f32 %v774_v26  ;;  %v778_v33 = vpop.f32.mrf.mxu0  ;;  %3310 = vmatprep.subr.mxu0 %v1217_v41 }
 0x198   : > { %v3852_v35 = vpop.eup %3851  ;;  %v779_v36 = vadd.f32 %v4881_v7, %v778_v33  ;;  %3248 = vmatprep.mubr.f32.mxu1 %v3850_v31  ;;  %v3206_v48 = vpop.f32.mrf.mxu1  ;;  %3311 = vmatpush3.msra.mxu0 %v1217_v41 }
 0x199   : > { %v3185_v37 = vpop.f32.mrf.mxu0  ;;  %3249 = vmatmul.mubr.f32.vlgmr.msra.gmra.mxu1 %v3852_v35  ;;  %v864_v19 = vadd.f32 %v3206_v48, %v4881_v7  ;;  %v1209_v48 = vld [vmem:[#allocation8] sm:$0xff] }
 0x19a   : > { %3865 = vtanh.f32 %v779_v36  ;;  %v794_v39 = vadd.f32 %v3185_v37, %v4881_v7  ;;  %v858_v56 = vpop.f32.mrf.mxu1 }
 0x19b   : > { %v3854_v38 = vpop.eup %3853  ;;  %3867 = vtanh.f32 %v784_v32  ;;  %v788_v40 = vpop.f32.mrf.mxu0  ;;  %v859_v12 = vadd.f32 %v4881_v7, %v858_v56  ;;  %v1497_v56 = vld [vmem:[#allocation10 + $0x40] sm:$0xff] }
 0x19c   : > { %v3856_v42 = vpop.eup %3855  ;;  %v789_v43 = vadd.f32 %v4881_v7, %v788_v40  ;;  %3251 = vmatprep.mubr.f32.mxu1 %v3854_v38  ;;  %v3209_v62 = vpop.f32.mrf.mxu1 }
 0x19d   : > { %v3188_v44 = vpop.f32.mrf.mxu0  ;;  %3252 = vmatmul.mubr.f32.gmra.mxu1 %v3856_v42  ;;  %v874_v24 = vadd.f32 %v3209_v62, %v4881_v7  ;;  %v1215_v42 = vld [vmem:[#allocation8 + $0x30] sm:$0xff] }
 0x19e   : > { %3869 = vtanh.f32 %v789_v43  ;;  %v804_v46 = vadd.f32 %v3188_v44, %v4881_v7  ;;  %v868_v3 = vpop.f32.mrf.mxu1  ;;  %v1214_v43 = vld [vmem:[#allocation8 + $0x28] sm:$0xff]  ;;  %v1213_v44 = vld [vmem:[#allocation8 + $0x20] sm:$0xff] }
 0x19f   : > { %v3858_v45 = vpop.eup %3857  ;;  %3871 = vtanh.f32 %v794_v39  ;;  %v798_v47 = vpop.f32.mrf.mxu0  ;;  %v869_v17 = vadd.f32 %v4881_v7, %v868_v3 }
 0x1a0   : > { %v3860_v49 = vpop.eup %3859  ;;  %v799_v50 = vadd.f32 %v4881_v7, %v798_v47  ;;  %3254 = vmatprep.mubr.f32.mxu1 %v3858_v45  ;;  %v3212_v9 = vpop.f32.mrf.mxu1  ;;  %v1212_v45 = vld [vmem:[#allocation8 + $0x18] sm:$0xff]  ;;  %v1210_v47 = vld [vmem:[#allocation8 + $0x8] sm:$0xff] }
 0x1a1   : > { %v3191_v51 = vpop.f32.mrf.mxu0  ;;  %3255 = vmatmul.mubr.f32.gmra.mxu1 %v3860_v49  ;;  %v884_v29 = vadd.f32 %v3212_v9, %v4881_v7  ;;  %v1504_v49 = vld [vmem:[#allocation10 + $0x78] sm:$0xff] }
 0x1a2   : > { %3873 = vtanh.f32 %v799_v50  ;;  %v814_v54 = vadd.f32 %v3191_v51, %v4881_v7  ;;  %v878_v15 = vpop.f32.mrf.mxu1  ;;  %v1503_v50 = vld [vmem:[#allocation10 + $0x70] sm:$0xff]  ;;  %3376 = vmatprep.subr.mxu1 %v1504_v49  ;;  %v1502_v51 = vld [vmem:[#allocation10 + $0x68] sm:$0xff] }
 0x1a3   : > { %v3862_v53 = vpop.eup %3861  ;;  %3875 = vtanh.f32 %v804_v46  ;;  %v808_v55 = vpop.f32.mrf.mxu0  ;;  %v879_v22 = vadd.f32 %v4881_v7, %v878_v15  ;;  %v1211_v46 = vld [vmem:[#allocation8 + $0x10] sm:$0xff]  ;;  %3377 = vmatpush3.msra.mxu1 %v1504_v49 }
 0x1a4   : > { %v3864_v57 = vpop.eup %3863  ;;  %v809_v58 = vadd.f32 %v4881_v7, %v808_v55  ;;  %3257 = vmatprep.mubr.f32.mxu1 %v3862_v53  ;;  %3877 = vtanh.f32 %v819_v52  ;;  %v3215_v20 = vpop.f32.mrf.mxu1  ;;  %3378 = vmatprep.subr.mxu1 %v1503_v50  ;;  %v1501_v52 = vld [vmem:[#allocation10 + $0x60] sm:$0xff]  ;;  %v1500_v53 = vld [vmem:[#allocation10 + $0x58] sm:$0xff]  ;;  %v1498_v55 = vld [vmem:[#allocation10 + $0x48] sm:$0xff] }
 0x1a5   : > { %3258 = vmatmul.mubr.f32.gmra.mxu1 %v3864_v57  ;;  %v894_v32 = vadd.f32 %v3215_v20, %v4881_v7  ;;  %v1496_v57 = vld [vmem:[#allocation10 + $0x38] sm:$0xff] }
 0x1a6   : > { %3879 = vtanh.f32 %v809_v58  ;;  %v888_v25 = vpop.f32.mrf.mxu1  ;;  %3379 = vmatpush3.msra.mxu1 %v1503_v50  ;;  %v1495_v58 = vld [vmem:[#allocation10 + $0x30] sm:$0xff] }
 0x1a7   : > { %v3866_v60 = vpop.eup %3865  ;;  %3881 = vtanh.f32 %v814_v54  ;;  %v889_v27 = vadd.f32 %v4881_v7, %v888_v25  ;;  %v1216_v7 = vld [vmem:[#allocation8 + $0x38] sm:$0xff]  ;;  %3380 = vmatprep.subr.mxu1 %v1502_v51  ;;  %v1499_v54 = vld [vmem:[#allocation10 + $0x50] sm:$0xff] }
 0x1a8   : > { %v3868_v63 = vpop.eup %3867  ;;  %3260 = vmatprep.mubr.f32.mxu1 %v3866_v60  ;;  %3883 = vtanh.f32 %v829_v59  ;;  %3312 = vmatprep.subr.mxu0 %v1216_v7  ;;  %v1494_v59 = vld [vmem:[#allocation10 + $0x28] sm:$0xff]  ;;  %v1493_v60 = vld [vmem:[#allocation10 + $0x20] sm:$0xff] }
 0x1a9   : > { %3261 = vmatmul.mubr.f32.gmra.mxu1 %v3868_v63  ;;  %3885 = vtanh.f32 %v824_v61  ;;  %3313 = vmatpush3.msra.mxu0 %v1216_v7  ;;  %v4930_v61 = vld [vmem:[%s5239_s4] ss:$0 sm:$0xff] }
 0x1aa   : > { %3887 = vtanh.f32 %v839_v0  ;;  %3314 = vmatprep.subr.mxu0 %v1215_v42  ;;  %3381 = vmatpush3.msra.mxu1 %v1502_v51 }
 0x1ab   : > { %v3870_v1 = vpop.eup %3869  ;;  %3889 = vtanh.f32 %v834_v2  ;;  %3315 = vmatpush3.msra.mxu0 %v1215_v42  ;;  %3382 = vmatprep.subr.mxu1 %v1501_v52 }
 0x1ac   : > { %v3872_v4 = vpop.eup %3871  ;;  %3263 = vmatprep.mubr.f32.mxu1 %v3870_v1  ;;  %3891 = vtanh.f32 %v849_v5  ;;  %3316 = vmatprep.subr.mxu0 %v1214_v43 }
 0x1ad   : > { %3264 = vmatmul.mubr.f32.gmra.mxu1 %v3872_v4  ;;  %3893 = vtanh.f32 %v844_v8  ;;  %3317 = vmatpush3.msra.mxu0 %v1214_v43 }
 0x1ae   : > { %3895 = vtanh.f32 %v859_v12  ;;  %3318 = vmatprep.subr.mxu0 %v1213_v44  ;;  %3383 = vmatpush3.msra.mxu1 %v1501_v52 }
 0x1af   : > { %v3874_v6 = vpop.eup %3873  ;;  %3897 = vtanh.f32 %v854_v14  ;;  %3319 = vmatpush3.msra.mxu0 %v1213_v44  ;;  %3384 = vmatprep.subr.mxu1 %v1500_v53 }
 0x1b0   : > { %v3876_v10 = vpop.eup %3875  ;;  %3266 = vmatprep.mubr.f32.mxu1 %v3874_v6  ;;  %3899 = vtanh.f32 %v869_v17  ;;  %3320 = vmatprep.subr.mxu0 %v1212_v45 }
 0x1b1   : > { %3267 = vmatmul.mubr.f32.gmra.mxu1 %v3876_v10  ;;  %v3878_v11 = vpop.eup %3877  ;;  %3901 = vtanh.f32 %v864_v19  ;;  %3321 = vmatpush3.msra.mxu0 %v1212_v45 }
 0x1b2   : > { %3903 = vtanh.f32 %v879_v22  ;;  %3322 = vmatprep.subr.mxu0 %v1211_v46  ;;  %3385 = vmatpush3.msra.mxu1 %v1500_v53 }
 0x1b3   : > { %v3880_v13 = vpop.eup %3879  ;;  %3905 = vtanh.f32 %v874_v24  ;;  %3323 = vmatpush3.msra.mxu0 %v1211_v46  ;;  %3386 = vmatprep.subr.mxu1 %v1499_v54 }
 0x1b4   : > { %v3882_v16 = vpop.eup %3881  ;;  %3269 = vmatprep.mubr.f32.mxu1 %v3880_v13  ;;  %3907 = vtanh.f32 %v889_v27  ;;  %3324 = vmatprep.subr.mxu0 %v1210_v47 }
 0x1b5   : > { %3270 = vmatmul.mubr.f32.gmra.mxu1 %v3882_v16  ;;  %v3884_v18 = vpop.eup %3883  ;;  %3909 = vtanh.f32 %v884_v29  ;;  %3325 = vmatpush3.msra.mxu0 %v1210_v47 }
 0x1b6   : > { %3272 = vmatprep.mubr.f32.mxu1 %v3878_v11  ;;  %v3886_v21 = vpop.eup %3885  ;;  %3911 = vtanh.f32 %v894_v32  ;;  %3326 = vmatprep.subr.mxu0 %v1209_v48 }
 0x1b7   : > { %v3888_v23 = vpop.eup %3887  ;;  %3327 = vmatpush3.msra.mxu0 %v1209_v48  ;;  %3387 = vmatpush3.msra.mxu1 %v1499_v54 }
 0x1b8   : > { %v3890_v26 = vpop.eup %3889  ;;  %3388 = vmatprep.subr.mxu1 %v1498_v55 }
 0x1b9   : > { %3273 = vmatmul.mubr.f32.gmra.mxu1 %v3886_v21  ;;  %v3892_v28 = vpop.eup %3891 }
 0x1ba   : > { %3275 = vmatprep.mubr.f32.mxu1 %v3884_v18  ;;  %v3894_v30 = vpop.eup %3893  ;;  %3389 = vmatpush3.msra.mxu1 %v1498_v55 }
 0x1bb   : > { %v3896_v31 = vpop.eup %3895  ;;  %3390 = vmatprep.subr.mxu1 %v1497_v56 }
 0x1bc   : > { %v3898_v33 = vpop.eup %3897  ;;  %3391 = vmatpush3.msra.mxu1 %v1497_v56 }
 0x1bd   : > { %3276 = vmatmul.mubr.f32.gmra.mxu1 %v3890_v26  ;;  %v3900_v34 = vpop.eup %3899  ;;  %3392 = vmatprep.subr.mxu1 %v1496_v57 }
 0x1be   : > { %3278 = vmatprep.mubr.f32.mxu1 %v3888_v23  ;;  %v3902_v35 = vpop.eup %3901  ;;  %3393 = vmatpush3.msra.mxu1 %v1496_v57 }
 0x1bf   : > { %v3904_v36 = vpop.eup %3903  ;;  %3394 = vmatprep.subr.mxu1 %v1495_v58 }
 0x1c0   : > { %v3906_v37 = vpop.eup %3905  ;;  %3395 = vmatpush3.msra.mxu1 %v1495_v58 }
 0x1c1   : > { %3279 = vmatmul.mubr.f32.gmra.mxu1 %v3894_v30  ;;  %v3908_v38 = vpop.eup %3907  ;;  %3396 = vmatprep.subr.mxu1 %v1494_v59 }
 0x1c2   : > { %3281 = vmatprep.mubr.f32.mxu1 %v3892_v28  ;;  %v3910_v39 = vpop.eup %3909  ;;  %3397 = vmatpush3.msra.mxu1 %v1494_v59 }
 0x1c3   : > { %v3912_v40 = vpop.eup %3911  ;;  %3398 = vmatprep.subr.mxu1 %v1493_v60 }
 0x1c4   : > { %3399 = vmatpush3.msra.mxu1 %v1493_v60 }
 0x1c5   : > { %3282 = vmatmul.mubr.f32.gmra.mxu1 %v3898_v33 }
 0x1c6   : > { %3284 = vmatprep.mubr.f32.mxu1 %v3896_v31 }
 0x1c9   : > { %3285 = vmatmul.mubr.f32.gmra.mxu1 %v3902_v35 }
 0x1ca   : > { %3287 = vmatprep.mubr.f32.mxu1 %v3900_v34 }
 0x1cd   : > { %3288 = vmatmul.mubr.f32.gmra.mxu1 %v3906_v37 }
 0x1ce   : > { %3290 = vmatprep.mubr.f32.mxu1 %v3904_v36 }
 0x1d1   : > { %3291 = vmatmul.mubr.f32.gmra.mxu1 %v3910_v39 }
 0x1d2   : > { %3293 = vmatprep.mubr.f32.mxu1 %v3908_v38 }
 0x1d5   : > { %3294 = vmatmul.mubr.f32.gmra.mxu1 %v3912_v40 }
 0x259   : > { %v3250_v62 = vpop.f32.mrf.mxu1 }
 0x25a   : > { %v1024_v63 = vadd.f32 %v3250_v62, %v4930_v61 }
 0x25b   : > { %v1018_v0 = vpop.f32.mrf.mxu1 }
 0x25c   : > { %v1019_v1 = vadd.f32 %v4930_v61, %v1018_v0 }
 0x25d   : > { %v3253_v2 = vpop.f32.mrf.mxu1 }
 0x25e   : > { %3913 = vtanh.f32 %v1019_v1  ;;  %v1034_v3 = vadd.f32 %v3253_v2, %v4930_v61 }
 0x25f   : > { %3915 = vtanh.f32 %v1024_v63  ;;  %v1028_v4 = vpop.f32.mrf.mxu1 }
 0x260   : > { %v1029_v5 = vadd.f32 %v4930_v61, %v1028_v4 }
 0x261   : > { %v3256_v6 = vpop.f32.mrf.mxu1 }
 0x262   : > { %3917 = vtanh.f32 %v1029_v5  ;;  %v1044_v8 = vadd.f32 %v3256_v6, %v4930_v61 }
 0x263   : > { %3919 = vtanh.f32 %v1034_v3  ;;  %v1038_v9 = vpop.f32.mrf.mxu1 }
 0x264   : > { %v1039_v10 = vadd.f32 %v4930_v61, %v1038_v9 }
 0x265   : > { %v3259_v11 = vpop.f32.mrf.mxu1 }
 0x266   : > { %3921 = vtanh.f32 %v1039_v10  ;;  %v1054_v12 = vadd.f32 %v3259_v11, %v4930_v61 }
 0x267   : > { %3923 = vtanh.f32 %v1044_v8  ;;  %v1048_v13 = vpop.f32.mrf.mxu1 }
 0x268   : > { %v1049_v14 = vadd.f32 %v4930_v61, %v1048_v13 }
 0x269   : > { %v3262_v15 = vpop.f32.mrf.mxu1 }
 0x26a   : > { %3925 = vtanh.f32 %v1049_v14  ;;  %v1064_v17 = vadd.f32 %v3262_v15, %v4930_v61 }
 0x26b   : > { %v3914_v16 = vpop.eup %3913  ;;  %3927 = vtanh.f32 %v1054_v12  ;;  %v1058_v18 = vpop.f32.mrf.mxu1 }
 0x26c   : > { %v3916_v19 = vpop.eup %3915  ;;  %v1059_v20 = vadd.f32 %v4930_v61, %v1058_v18  ;;  %3328 = vmatprep.mubr.f32.mxu0 %v3914_v16 }
 0x26d   : > { %v3265_v21 = vpop.f32.mrf.mxu1  ;;  %3329 = vmatmul.mubr.f32.vlgmr.msra.gmra.mxu0 %v3916_v19 }
 0x26e   : > { %3929 = vtanh.f32 %v1059_v20  ;;  %v1074_v23 = vadd.f32 %v3265_v21, %v4930_v61 }
 0x26f   : > { %v3918_v22 = vpop.eup %3917  ;;  %3931 = vtanh.f32 %v1064_v17  ;;  %v1068_v24 = vpop.f32.mrf.mxu1 }
 0x270   : > { %v3920_v25 = vpop.eup %3919  ;;  %v1069_v26 = vadd.f32 %v4930_v61, %v1068_v24  ;;  %3331 = vmatprep.mubr.f32.mxu0 %v3918_v22 }
 0x271   : > { %v3268_v27 = vpop.f32.mrf.mxu1  ;;  %3332 = vmatmul.mubr.f32.gmra.mxu0 %v3920_v25 }
 0x272   : > { %3933 = vtanh.f32 %v1069_v26  ;;  %v1084_v29 = vadd.f32 %v3268_v27, %v4930_v61 }
 0x273   : > { %v3922_v28 = vpop.eup %3921  ;;  %3935 = vtanh.f32 %v1074_v23  ;;  %v1078_v30 = vpop.f32.mrf.mxu1 }
 0x274   : > { %v3924_v31 = vpop.eup %3923  ;;  %v1079_v32 = vadd.f32 %v4930_v61, %v1078_v30  ;;  %3334 = vmatprep.mubr.f32.mxu0 %v3922_v28 }
 0x275   : > { %v3271_v33 = vpop.f32.mrf.mxu1  ;;  %3335 = vmatmul.mubr.f32.gmra.mxu0 %v3924_v31 }
 0x276   : > { %3937 = vtanh.f32 %v1079_v32  ;;  %v1094_v35 = vadd.f32 %v3271_v33, %v4930_v61  ;;  %v1491_v32 = vld [vmem:[#allocation10 + $0x10] sm:$0xff]  ;;  %v1490_v33 = vld [vmem:[#allocation10 + $0x8] sm:$0xff] }
 0x277   : > { %v3926_v34 = vpop.eup %3925  ;;  %3939 = vtanh.f32 %v1084_v29  ;;  %v1088_v36 = vpop.f32.mrf.mxu1 }
 0x278   : > { %v3928_v37 = vpop.eup %3927  ;;  %v1089_v38 = vadd.f32 %v4930_v61, %v1088_v36  ;;  %3337 = vmatprep.mubr.f32.mxu0 %v3926_v34  ;;  %v1489_v34 = vld [vmem:[#allocation10] sm:$0xff]  ;;  %v1783_v36 = vld [vmem:[#allocation11 + $0x70] sm:$0xff] }
 0x279   : > { %v3274_v39 = vpop.f32.mrf.mxu1  ;;  %3338 = vmatmul.mubr.f32.gmra.mxu0 %v3928_v37  ;;  %v1782_v37 = vld [vmem:[#allocation11 + $0x68] sm:$0xff] }
 0x27a   : > { %3941 = vtanh.f32 %v1089_v38  ;;  %v1104_v41 = vadd.f32 %v3274_v39, %v4930_v61  ;;  %v1781_v38 = vld [vmem:[#allocation11 + $0x60] sm:$0xff]  ;;  %v1780_v39 = vld [vmem:[#allocation11 + $0x58] sm:$0xff] }
 0x27b   : > { %v3930_v40 = vpop.eup %3929  ;;  %3943 = vtanh.f32 %v1094_v35  ;;  %v1098_v7 = vpop.f32.mrf.mxu1  ;;  %v1784_v35 = vld [vmem:[#allocation11 + $0x78] sm:$0xff] }
 0x27c   : > { %v3932_v42 = vpop.eup %3931  ;;  %v1099_v43 = vadd.f32 %v4930_v61, %v1098_v7  ;;  %3340 = vmatprep.mubr.f32.mxu0 %v3930_v40  ;;  %3456 = vmatprep.subr.mxu0 %v1784_v35  ;;  %v1779_v40 = vld [vmem:[#allocation11 + $0x50] sm:$0xff]  ;;  %v1777_v7 = vld [vmem:[#allocation11 + $0x40] sm:$0xff] }
 0x27d   : > { %v3277_v44 = vpop.f32.mrf.mxu1  ;;  %3341 = vmatmul.mubr.f32.gmra.mxu0 %v3932_v42  ;;  %v1776_v42 = vld [vmem:[#allocation11 + $0x38] sm:$0xff] }
 0x27e   : > { %3945 = vtanh.f32 %v1099_v43  ;;  %v1114_v46 = vadd.f32 %v3277_v44, %v4930_v61  ;;  %3457 = vmatpush3.msra.mxu0 %v1784_v35  ;;  %v1775_v43 = vld [vmem:[#allocation11 + $0x30] sm:$0xff]  ;;  %v1774_v44 = vld [vmem:[#allocation11 + $0x28] sm:$0xff] }
 0x27f   : > { %v3934_v45 = vpop.eup %3933  ;;  %3947 = vtanh.f32 %v1104_v41  ;;  %v1108_v47 = vpop.f32.mrf.mxu1  ;;  %3458 = vmatprep.subr.mxu0 %v1783_v36  ;;  %v1778_v41 = vld [vmem:[#allocation11 + $0x48] sm:$0xff] }
 0x280   : > { %v3936_v48 = vpop.eup %3935  ;;  %v1109_v49 = vadd.f32 %v4930_v61, %v1108_v47  ;;  %3343 = vmatprep.mubr.f32.mxu0 %v3934_v45  ;;  %3459 = vmatpush3.msra.mxu0 %v1783_v36  ;;  %v1773_v45 = vld [vmem:[#allocation11 + $0x20] sm:$0xff] }
 0x281   : > { %v3280_v50 = vpop.f32.mrf.mxu1  ;;  %3344 = vmatmul.mubr.f32.gmra.mxu0 %v3936_v48  ;;  %3460 = vmatprep.subr.mxu0 %v1782_v37 }
 0x282   : > { %3949 = vtanh.f32 %v1109_v49  ;;  %v1124_v52 = vadd.f32 %v3280_v50, %v4930_v61  ;;  %3461 = vmatpush3.msra.mxu0 %v1782_v37 }
 0x283   : > { %v3938_v51 = vpop.eup %3937  ;;  %3951 = vtanh.f32 %v1114_v46  ;;  %v1118_v53 = vpop.f32.mrf.mxu1  ;;  %3462 = vmatprep.subr.mxu0 %v1781_v38  ;;  %v4967_v46 = vld [vmem:[%s5241_s6] ss:$0 sm:$0xff] }
 0x284   : > { %v3940_v54 = vpop.eup %3939  ;;  %v1119_v55 = vadd.f32 %v4930_v61, %v1118_v53  ;;  %3346 = vmatprep.mubr.f32.mxu0 %v3938_v51  ;;  %3463 = vmatpush3.msra.mxu0 %v1781_v38 }
 0x285   : > { %v3283_v56 = vpop.f32.mrf.mxu1  ;;  %3347 = vmatmul.mubr.f32.gmra.mxu0 %v3940_v54  ;;  %3464 = vmatprep.subr.mxu0 %v1780_v39 }
 0x286   : > { %3953 = vtanh.f32 %v1119_v55  ;;  %v1134_v58 = vadd.f32 %v3283_v56, %v4930_v61  ;;  %3465 = vmatpush3.msra.mxu0 %v1780_v39 }
 0x287   : > { %v3942_v57 = vpop.eup %3941  ;;  %3955 = vtanh.f32 %v1124_v52  ;;  %v1128_v59 = vpop.f32.mrf.mxu1  ;;  %3466 = vmatprep.subr.mxu0 %v1779_v40 }
 0x288   : > { %v3944_v60 = vpop.eup %3943  ;;  %v1129_v62 = vadd.f32 %v4930_v61, %v1128_v59  ;;  %3349 = vmatprep.mubr.f32.mxu0 %v3942_v57  ;;  %3467 = vmatpush3.msra.mxu0 %v1779_v40 }
 0x289   : > { %v3286_v63 = vpop.f32.mrf.mxu1  ;;  %3350 = vmatmul.mubr.f32.gmra.mxu0 %v3944_v60  ;;  %3468 = vmatprep.subr.mxu0 %v1778_v41 }
 0x28a   : > { %3957 = vtanh.f32 %v1129_v62  ;;  %v1144_v1 = vadd.f32 %v3286_v63, %v4930_v61  ;;  %3469 = vmatpush3.msra.mxu0 %v1778_v41 }
 0x28b   : > { %v3946_v0 = vpop.eup %3945  ;;  %3959 = vtanh.f32 %v1134_v58  ;;  %v1138_v2 = vpop.f32.mrf.mxu1  ;;  %3470 = vmatprep.subr.mxu0 %v1777_v7 }
 0x28c   : > { %v3948_v3 = vpop.eup %3947  ;;  %v1139_v4 = vadd.f32 %v4930_v61, %v1138_v2  ;;  %3352 = vmatprep.mubr.f32.mxu0 %v3946_v0  ;;  %3471 = vmatpush3.msra.mxu0 %v1777_v7 }
 0x28d   : > { %v3289_v5 = vpop.f32.mrf.mxu1  ;;  %3353 = vmatmul.mubr.f32.gmra.mxu0 %v3948_v3  ;;  %3472 = vmatprep.subr.mxu0 %v1776_v42 }
 0x28e   : > { %3961 = vtanh.f32 %v1139_v4  ;;  %v1154_v8 = vadd.f32 %v3289_v5, %v4930_v61  ;;  %3473 = vmatpush3.msra.mxu0 %v1776_v42 }
 0x28f   : > { %v3950_v6 = vpop.eup %3949  ;;  %3963 = vtanh.f32 %v1144_v1  ;;  %v1148_v9 = vpop.f32.mrf.mxu1  ;;  %3474 = vmatprep.subr.mxu0 %v1775_v43 }
 0x290   : > { %v3952_v10 = vpop.eup %3951  ;;  %v1149_v11 = vadd.f32 %v4930_v61, %v1148_v9  ;;  %3355 = vmatprep.mubr.f32.mxu0 %v3950_v6  ;;  %3475 = vmatpush3.msra.mxu0 %v1775_v43 }
 0x291   : > { %v3292_v12 = vpop.f32.mrf.mxu1  ;;  %3356 = vmatmul.mubr.f32.gmra.mxu0 %v3952_v10  ;;  %3476 = vmatprep.subr.mxu0 %v1774_v44 }
 0x292   : > { %3965 = vtanh.f32 %v1149_v11  ;;  %v1164_v14 = vadd.f32 %v3292_v12, %v4930_v61  ;;  %3477 = vmatpush3.msra.mxu0 %v1774_v44 }
 0x293   : > { %v3954_v13 = vpop.eup %3953  ;;  %3967 = vtanh.f32 %v1154_v8  ;;  %v1158_v15 = vpop.f32.mrf.mxu1  ;;  %3478 = vmatprep.subr.mxu0 %v1773_v45 }
 0x294   : > { %v3956_v16 = vpop.eup %3955  ;;  %v1159_v17 = vadd.f32 %v4930_v61, %v1158_v15  ;;  %3358 = vmatprep.mubr.f32.mxu0 %v3954_v13  ;;  %3479 = vmatpush3.msra.mxu0 %v1773_v45 }
 0x295   : > { %v3295_v18 = vpop.f32.mrf.mxu1  ;;  %3359 = vmatmul.mubr.f32.gmra.mxu0 %v3956_v16 }
 0x296   : > { %3969 = vtanh.f32 %v1159_v17  ;;  %v1174_v20 = vadd.f32 %v3295_v18, %v4930_v61 }
 0x297   : > { %v3958_v19 = vpop.eup %3957  ;;  %3971 = vtanh.f32 %v1164_v14  ;;  %v1168_v21 = vpop.f32.mrf.mxu1 }
 0x298   : > { %v3960_v22 = vpop.eup %3959  ;;  %v1169_v23 = vadd.f32 %v4930_v61, %v1168_v21  ;;  %3361 = vmatprep.mubr.f32.mxu0 %v3958_v19  ;;  %v1492_v61 = vld [vmem:[#allocation10 + $0x18] sm:$0xff] }
 0x299   : > { %3362 = vmatmul.mubr.f32.gmra.mxu0 %v3960_v22  ;;  %3400 = vmatprep.subr.mxu1 %v1492_v61 }
 0x29a   : > { %3973 = vtanh.f32 %v1169_v23  ;;  %3401 = vmatpush3.msra.mxu1 %v1492_v61 }
 0x29b   : > { %v3962_v24 = vpop.eup %3961  ;;  %3975 = vtanh.f32 %v1174_v20  ;;  %3402 = vmatprep.subr.mxu1 %v1491_v32 }
 0x29c   : > { %v3964_v25 = vpop.eup %3963  ;;  %3364 = vmatprep.mubr.f32.mxu0 %v3962_v24  ;;  %3403 = vmatpush3.msra.mxu1 %v1491_v32 }
 0x29d   : > { %3365 = vmatmul.mubr.f32.gmra.mxu0 %v3964_v25  ;;  %3404 = vmatprep.subr.mxu1 %v1490_v33 }
 0x29e   : > { %3405 = vmatpush3.msra.mxu1 %v1490_v33 }
 0x29f   : > { %v3966_v26 = vpop.eup %3965  ;;  %3406 = vmatprep.subr.mxu1 %v1489_v34 }
 0x2a0   : > { %v3968_v27 = vpop.eup %3967  ;;  %3367 = vmatprep.mubr.f32.mxu0 %v3966_v26  ;;  %3407 = vmatpush3.msra.mxu1 %v1489_v34 }
 0x2a1   : > { %3368 = vmatmul.mubr.f32.gmra.mxu0 %v3968_v27 }
 0x2a3   : > { %v3970_v28 = vpop.eup %3969 }
 0x2a4   : > { %v3972_v29 = vpop.eup %3971  ;;  %3370 = vmatprep.mubr.f32.mxu0 %v3970_v28 }
 0x2a5   : > { %3371 = vmatmul.mubr.f32.gmra.mxu0 %v3972_v29 }
 0x2a7   : > { %v3974_v30 = vpop.eup %3973 }
 0x2a8   : > { %v3976_v31 = vpop.eup %3975  ;;  %3373 = vmatprep.mubr.f32.mxu0 %v3974_v30 }
 0x2a9   : > { %3374 = vmatmul.mubr.f32.gmra.mxu0 %v3976_v31 }
 0x32d   : > { %v3330_v47 = vpop.f32.mrf.mxu0 }
 0x32e   : > { %v1304_v48 = vadd.f32 %v3330_v47, %v4967_v46 }
 0x32f   : > { %v1298_v49 = vpop.f32.mrf.mxu0 }
 0x330   : > { %v1299_v50 = vadd.f32 %v4967_v46, %v1298_v49 }
 0x331   : > { %v3333_v51 = vpop.f32.mrf.mxu0 }
 0x332   : > { %3977 = vtanh.f32 %v1299_v50  ;;  %v1314_v52 = vadd.f32 %v3333_v51, %v4967_v46 }
 0x333   : > { %3979 = vtanh.f32 %v1304_v48  ;;  %v1308_v53 = vpop.f32.mrf.mxu0 }
 0x334   : > { %v1309_v54 = vadd.f32 %v4967_v46, %v1308_v53 }
 0x335   : > { %v3336_v55 = vpop.f32.mrf.mxu0 }
 0x336   : > { %3981 = vtanh.f32 %v1309_v54  ;;  %v1324_v56 = vadd.f32 %v3336_v55, %v4967_v46 }
 0x337   : > { %3983 = vtanh.f32 %v1314_v52  ;;  %v1318_v57 = vpop.f32.mrf.mxu0 }
 0x338   : > { %v1319_v58 = vadd.f32 %v4967_v46, %v1318_v57 }
 0x339   : > { %v3339_v59 = vpop.f32.mrf.mxu0 }
 0x33a   : > { %3985 = vtanh.f32 %v1319_v58  ;;  %v1334_v60 = vadd.f32 %v3339_v59, %v4967_v46 }
 0x33b   : > { %3987 = vtanh.f32 %v1324_v56  ;;  %v1328_v62 = vpop.f32.mrf.mxu0 }
 0x33c   : > { %v1329_v63 = vadd.f32 %v4967_v46, %v1328_v62 }
 0x33d   : > { %v3342_v0 = vpop.f32.mrf.mxu0 }
 0x33e   : > { %3989 = vtanh.f32 %v1329_v63  ;;  %v1344_v2 = vadd.f32 %v3342_v0, %v4967_v46 }
 0x33f   : > { %v3978_v1 = vpop.eup %3977  ;;  %3991 = vtanh.f32 %v1334_v60  ;;  %v1338_v3 = vpop.f32.mrf.mxu0 }
 0x340   : > { %v3980_v4 = vpop.eup %3979  ;;  %v1339_v5 = vadd.f32 %v4967_v46, %v1338_v3  ;;  %3408 = vmatprep.mubr.f32.mxu1 %v3978_v1 }
 0x341   : > { %v3345_v6 = vpop.f32.mrf.mxu0  ;;  %3409 = vmatmul.mubr.f32.vlgmr.msra.gmra.mxu1 %v3980_v4 }
 0x342   : > { %3993 = vtanh.f32 %v1339_v5  ;;  %v1354_v9 = vadd.f32 %v3345_v6, %v4967_v46 }
 0x343   : > { %v3982_v8 = vpop.eup %3981  ;;  %3995 = vtanh.f32 %v1344_v2  ;;  %v1348_v10 = vpop.f32.mrf.mxu0 }
 0x344   : > { %v3984_v11 = vpop.eup %3983  ;;  %v1349_v12 = vadd.f32 %v4967_v46, %v1348_v10  ;;  %3411 = vmatprep.mubr.f32.mxu1 %v3982_v8 }
 0x345   : > { %v3348_v13 = vpop.f32.mrf.mxu0  ;;  %3412 = vmatmul.mubr.f32.gmra.mxu1 %v3984_v11 }
 0x346   : > { %3997 = vtanh.f32 %v1349_v12  ;;  %v1364_v15 = vadd.f32 %v3348_v13, %v4967_v46 }
 0x347   : > { %v3986_v14 = vpop.eup %3985  ;;  %3999 = vtanh.f32 %v1354_v9  ;;  %v1358_v16 = vpop.f32.mrf.mxu0 }
 0x348   : > { %v3988_v17 = vpop.eup %3987  ;;  %v1359_v18 = vadd.f32 %v4967_v46, %v1358_v16  ;;  %3414 = vmatprep.mubr.f32.mxu1 %v3986_v14 }
 0x349   : > { %v3351_v19 = vpop.f32.mrf.mxu0  ;;  %3415 = vmatmul.mubr.f32.gmra.mxu1 %v3988_v17 }
 0x34a   : > { %4001 = vtanh.f32 %v1359_v18  ;;  %v1374_v21 = vadd.f32 %v3351_v19, %v4967_v46  ;;  %v1771_v18 = vld [vmem:[#allocation11 + $0x10] sm:$0xff]  ;;  %v1770_v19 = vld [vmem:[#allocation11 + $0x8] sm:$0xff] }
 0x34b   : > { %v3990_v20 = vpop.eup %3989  ;;  %4003 = vtanh.f32 %v1364_v15  ;;  %v1368_v22 = vpop.f32.mrf.mxu0 }
 0x34c   : > { %v3992_v23 = vpop.eup %3991  ;;  %v1369_v24 = vadd.f32 %v4967_v46, %v1368_v22  ;;  %3417 = vmatprep.mubr.f32.mxu1 %v3990_v20  ;;  %v1769_v20 = vld [vmem:[#allocation11] sm:$0xff]  ;;  %v2063_v22 = vld [vmem:[#allocation13 + $0x70] sm:$0xff] }
 0x34d   : > { %v3354_v25 = vpop.f32.mrf.mxu0  ;;  %3418 = vmatmul.mubr.f32.gmra.mxu1 %v3992_v23  ;;  %v2062_v23 = vld [vmem:[#allocation13 + $0x68] sm:$0xff] }
 0x34e   : > { %4005 = vtanh.f32 %v1369_v24  ;;  %v1384_v27 = vadd.f32 %v3354_v25, %v4967_v46  ;;  %v2061_v24 = vld [vmem:[#allocation13 + $0x60] sm:$0xff]  ;;  %v2060_v25 = vld [vmem:[#allocation13 + $0x58] sm:$0xff] }
 0x34f   : > { %v3994_v26 = vpop.eup %3993  ;;  %4007 = vtanh.f32 %v1374_v21  ;;  %v1378_v28 = vpop.f32.mrf.mxu0  ;;  %v2064_v21 = vld [vmem:[#allocation13 + $0x78] sm:$0xff] }
 0x350   : > { %v3996_v29 = vpop.eup %3995  ;;  %v1379_v30 = vadd.f32 %v4967_v46, %v1378_v28  ;;  %3420 = vmatprep.mubr.f32.mxu1 %v3994_v26  ;;  %3536 = vmatprep.subr.mxu1 %v2064_v21  ;;  %v2059_v26 = vld [vmem:[#allocation13 + $0x50] sm:$0xff]  ;;  %v2057_v28 = vld [vmem:[#allocation13 + $0x40] sm:$0xff] }
 0x351   : > { %v3357_v31 = vpop.f32.mrf.mxu0  ;;  %3421 = vmatmul.mubr.f32.gmra.mxu1 %v3996_v29  ;;  %v2056_v29 = vld [vmem:[#allocation13 + $0x38] sm:$0xff] }
 0x352   : > { %4009 = vtanh.f32 %v1379_v30  ;;  %v1394_v32 = vadd.f32 %v3357_v31, %v4967_v46  ;;  %3537 = vmatpush3.msra.mxu1 %v2064_v21  ;;  %v2055_v30 = vld [vmem:[#allocation13 + $0x30] sm:$0xff]  ;;  %v2054_v31 = vld [vmem:[#allocation13 + $0x28] sm:$0xff] }
 0x353   : > { %v3998_v61 = vpop.eup %3997  ;;  %4011 = vtanh.f32 %v1384_v27  ;;  %v1388_v33 = vpop.f32.mrf.mxu0  ;;  %3538 = vmatprep.subr.mxu1 %v2063_v22  ;;  %v2058_v27 = vld [vmem:[#allocation13 + $0x48] sm:$0xff] }
 0x354   : > { %v4000_v34 = vpop.eup %3999  ;;  %v1389_v35 = vadd.f32 %v4967_v46, %v1388_v33  ;;  %3423 = vmatprep.mubr.f32.mxu1 %v3998_v61  ;;  %3539 = vmatpush3.msra.mxu1 %v2063_v22  ;;  %v2053_v61 = vld [vmem:[#allocation13 + $0x20] sm:$0xff] }
 0x355   : > { %v3360_v36 = vpop.f32.mrf.mxu0  ;;  %3424 = vmatmul.mubr.f32.gmra.mxu1 %v4000_v34  ;;  %3540 = vmatprep.subr.mxu1 %v2062_v23 }
 0x356   : > { %4013 = vtanh.f32 %v1389_v35  ;;  %v1404_v38 = vadd.f32 %v3360_v36, %v4967_v46  ;;  %3541 = vmatpush3.msra.mxu1 %v2062_v23 }
 0x357   : > { %v4002_v37 = vpop.eup %4001  ;;  %4015 = vtanh.f32 %v1394_v32  ;;  %v1398_v39 = vpop.f32.mrf.mxu0  ;;  %3542 = vmatprep.subr.mxu1 %v2061_v24  ;;  %v5004_v32 = vld [vmem:[%s5243_s8] ss:$0 sm:$0xff] }
 0x358   : > { %v4004_v40 = vpop.eup %4003  ;;  %v1399_v41 = vadd.f32 %v4967_v46, %v1398_v39  ;;  %3426 = vmatprep.mubr.f32.mxu1 %v4002_v37  ;;  %3543 = vmatpush3.msra.mxu1 %v2061_v24 }
 0x359   : > { %v3363_v7 = vpop.f32.mrf.mxu0  ;;  %3427 = vmatmul.mubr.f32.gmra.mxu1 %v4004_v40  ;;  %3544 = vmatprep.subr.mxu1 %v2060_v25 }
 0x35a   : > { %4017 = vtanh.f32 %v1399_v41  ;;  %v1414_v43 = vadd.f32 %v3363_v7, %v4967_v46  ;;  %3545 = vmatpush3.msra.mxu1 %v2060_v25 }
 0x35b   : > { %v4006_v42 = vpop.eup %4005  ;;  %4019 = vtanh.f32 %v1404_v38  ;;  %v1408_v44 = vpop.f32.mrf.mxu0  ;;  %3546 = vmatprep.subr.mxu1 %v2059_v26 }
 0x35c   : > { %v4008_v45 = vpop.eup %4007  ;;  %v1409_v47 = vadd.f32 %v4967_v46, %v1408_v44  ;;  %3429 = vmatprep.mubr.f32.mxu1 %v4006_v42  ;;  %3547 = vmatpush3.msra.mxu1 %v2059_v26 }
 0x35d   : > { %v3366_v48 = vpop.f32.mrf.mxu0  ;;  %3430 = vmatmul.mubr.f32.gmra.mxu1 %v4008_v45  ;;  %3548 = vmatprep.subr.mxu1 %v2058_v27 }
 0x35e   : > { %4021 = vtanh.f32 %v1409_v47  ;;  %v1424_v50 = vadd.f32 %v3366_v48, %v4967_v46  ;;  %3549 = vmatpush3.msra.mxu1 %v2058_v27 }
 0x35f   : > { %v4010_v49 = vpop.eup %4009  ;;  %4023 = vtanh.f32 %v1414_v43  ;;  %v1418_v51 = vpop.f32.mrf.mxu0  ;;  %3550 = vmatprep.subr.mxu1 %v2057_v28 }
 0x360   : > { %v4012_v52 = vpop.eup %4011  ;;  %v1419_v53 = vadd.f32 %v4967_v46, %v1418_v51  ;;  %3432 = vmatprep.mubr.f32.mxu1 %v4010_v49  ;;  %3551 = vmatpush3.msra.mxu1 %v2057_v28 }
 0x361   : > { %v3369_v54 = vpop.f32.mrf.mxu0  ;;  %3433 = vmatmul.mubr.f32.gmra.mxu1 %v4012_v52  ;;  %3552 = vmatprep.subr.mxu1 %v2056_v29 }
 0x362   : > { %4025 = vtanh.f32 %v1419_v53  ;;  %v1434_v56 = vadd.f32 %v3369_v54, %v4967_v46  ;;  %3553 = vmatpush3.msra.mxu1 %v2056_v29 }
 0x363   : > { %v4014_v55 = vpop.eup %4013  ;;  %4027 = vtanh.f32 %v1424_v50  ;;  %v1428_v57 = vpop.f32.mrf.mxu0  ;;  %3554 = vmatprep.subr.mxu1 %v2055_v30 }
 0x364   : > { %v4016_v58 = vpop.eup %4015  ;;  %v1429_v59 = vadd.f32 %v4967_v46, %v1428_v57  ;;  %3435 = vmatprep.mubr.f32.mxu1 %v4014_v55  ;;  %3555 = vmatpush3.msra.mxu1 %v2055_v30 }
 0x365   : > { %v3372_v60 = vpop.f32.mrf.mxu0  ;;  %3436 = vmatmul.mubr.f32.gmra.mxu1 %v4016_v58  ;;  %3556 = vmatprep.subr.mxu1 %v2054_v31 }
 0x366   : > { %4029 = vtanh.f32 %v1429_v59  ;;  %v1444_v63 = vadd.f32 %v3372_v60, %v4967_v46  ;;  %3557 = vmatpush3.msra.mxu1 %v2054_v31 }
 0x367   : > { %v4018_v62 = vpop.eup %4017  ;;  %4031 = vtanh.f32 %v1434_v56  ;;  %v1438_v0 = vpop.f32.mrf.mxu0  ;;  %3558 = vmatprep.subr.mxu1 %v2053_v61 }
 0x368   : > { %v4020_v1 = vpop.eup %4019  ;;  %v1439_v2 = vadd.f32 %v4967_v46, %v1438_v0  ;;  %3438 = vmatprep.mubr.f32.mxu1 %v4018_v62  ;;  %3559 = vmatpush3.msra.mxu1 %v2053_v61 }
 0x369   : > { %v3375_v3 = vpop.f32.mrf.mxu0  ;;  %3439 = vmatmul.mubr.f32.gmra.mxu1 %v4020_v1 }
 0x36a   : > { %4033 = vtanh.f32 %v1439_v2  ;;  %v1454_v5 = vadd.f32 %v3375_v3, %v4967_v46 }
 0x36b   : > { %v4022_v4 = vpop.eup %4021  ;;  %4035 = vtanh.f32 %v1444_v63  ;;  %v1448_v6 = vpop.f32.mrf.mxu0 }
 0x36c   : > { %v4024_v8 = vpop.eup %4023  ;;  %v1449_v9 = vadd.f32 %v4967_v46, %v1448_v6  ;;  %3441 = vmatprep.mubr.f32.mxu1 %v4022_v4  ;;  %v1772_v46 = vld [vmem:[#allocation11 + $0x18] sm:$0xff] }
 0x36d   : > { %3442 = vmatmul.mubr.f32.gmra.mxu1 %v4024_v8  ;;  %3480 = vmatprep.subr.mxu0 %v1772_v46 }
 0x36e   : > { %4037 = vtanh.f32 %v1449_v9  ;;  %3481 = vmatpush3.msra.mxu0 %v1772_v46 }
 0x36f   : > { %v4026_v10 = vpop.eup %4025  ;;  %4039 = vtanh.f32 %v1454_v5  ;;  %3482 = vmatprep.subr.mxu0 %v1771_v18 }
 0x370   : > { %v4028_v11 = vpop.eup %4027  ;;  %3444 = vmatprep.mubr.f32.mxu1 %v4026_v10  ;;  %3483 = vmatpush3.msra.mxu0 %v1771_v18 }
 0x371   : > { %3445 = vmatmul.mubr.f32.gmra.mxu1 %v4028_v11  ;;  %3484 = vmatprep.subr.mxu0 %v1770_v19 }
 0x372   : > { %3485 = vmatpush3.msra.mxu0 %v1770_v19 }
 0x373   : > { %v4030_v12 = vpop.eup %4029  ;;  %3486 = vmatprep.subr.mxu0 %v1769_v20 }
 0x374   : > { %v4032_v13 = vpop.eup %4031  ;;  %3447 = vmatprep.mubr.f32.mxu1 %v4030_v12  ;;  %3487 = vmatpush3.msra.mxu0 %v1769_v20 }
 0x375   : > { %3448 = vmatmul.mubr.f32.gmra.mxu1 %v4032_v13 }
 0x377   : > { %v4034_v14 = vpop.eup %4033 }
 0x378   : > { %v4036_v15 = vpop.eup %4035  ;;  %3450 = vmatprep.mubr.f32.mxu1 %v4034_v14 }
 0x379   : > { %3451 = vmatmul.mubr.f32.gmra.mxu1 %v4036_v15 }
 0x37b   : > { %v4038_v16 = vpop.eup %4037 }
 0x37c   : > { %v4040_v17 = vpop.eup %4039  ;;  %3453 = vmatprep.mubr.f32.mxu1 %v4038_v16 }
 0x37d   : > { %3454 = vmatmul.mubr.f32.gmra.mxu1 %v4040_v17 }
 0x401   : > { %v3410_v33 = vpop.f32.mrf.mxu1 }
 0x402   : > { %v1584_v34 = vadd.f32 %v3410_v33, %v5004_v32 }
 0x403   : > { %v1578_v35 = vpop.f32.mrf.mxu1 }
 0x404   : > { %v1579_v36 = vadd.f32 %v5004_v32, %v1578_v35 }
 0x405   : > { %v3413_v37 = vpop.f32.mrf.mxu1 }
 0x406   : > { %4041 = vtanh.f32 %v1579_v36  ;;  %v1594_v38 = vadd.f32 %v3413_v37, %v5004_v32 }
 0x407   : > { %4043 = vtanh.f32 %v1584_v34  ;;  %v1588_v39 = vpop.f32.mrf.mxu1 }
 0x408   : > { %v1589_v40 = vadd.f32 %v5004_v32, %v1588_v39 }
 0x409   : > { %v3416_v41 = vpop.f32.mrf.mxu1 }
 0x40a   : > { %4045 = vtanh.f32 %v1589_v40  ;;  %v1604_v7 = vadd.f32 %v3416_v41, %v5004_v32 }
 0x40b   : > { %4047 = vtanh.f32 %v1594_v38  ;;  %v1598_v42 = vpop.f32.mrf.mxu1 }
 0x40c   : > { %v1599_v43 = vadd.f32 %v5004_v32, %v1598_v42 }
 0x40d   : > { %v3419_v44 = vpop.f32.mrf.mxu1 }
 0x40e   : > { %4049 = vtanh.f32 %v1599_v43  ;;  %v1614_v45 = vadd.f32 %v3419_v44, %v5004_v32 }
 0x40f   : > { %4051 = vtanh.f32 %v1604_v7  ;;  %v1608_v47 = vpop.f32.mrf.mxu1 }
 0x410   : > { %v1609_v48 = vadd.f32 %v5004_v32, %v1608_v47 }
 0x411   : > { %v3422_v49 = vpop.f32.mrf.mxu1 }
 0x412   : > { %4053 = vtanh.f32 %v1609_v48  ;;  %v1624_v51 = vadd.f32 %v3422_v49, %v5004_v32 }
 0x413   : > { %v4042_v50 = vpop.eup %4041  ;;  %4055 = vtanh.f32 %v1614_v45  ;;  %v1618_v52 = vpop.f32.mrf.mxu1 }
 0x414   : > { %v4044_v53 = vpop.eup %4043  ;;  %v1619_v54 = vadd.f32 %v5004_v32, %v1618_v52  ;;  %3488 = vmatprep.mubr.f32.mxu0 %v4042_v50 }
 0x415   : > { %v3425_v55 = vpop.f32.mrf.mxu1  ;;  %3489 = vmatmul.mubr.f32.vlgmr.msra.gmra.mxu0 %v4044_v53 }
 0x416   : > { %4057 = vtanh.f32 %v1619_v54  ;;  %v1634_v57 = vadd.f32 %v3425_v55, %v5004_v32 }
 0x417   : > { %v4046_v56 = vpop.eup %4045  ;;  %4059 = vtanh.f32 %v1624_v51  ;;  %v1628_v58 = vpop.f32.mrf.mxu1 }
 0x418   : > { %v4048_v59 = vpop.eup %4047  ;;  %v1629_v60 = vadd.f32 %v5004_v32, %v1628_v58  ;;  %3491 = vmatprep.mubr.f32.mxu0 %v4046_v56 }
 0x419   : > { %v3428_v62 = vpop.f32.mrf.mxu1  ;;  %3492 = vmatmul.mubr.f32.gmra.mxu0 %v4048_v59 }
 0x41a   : > { %4061 = vtanh.f32 %v1629_v60  ;;  %v1644_v0 = vadd.f32 %v3428_v62, %v5004_v32 }
 0x41b   : > { %v4050_v63 = vpop.eup %4049  ;;  %4063 = vtanh.f32 %v1634_v57  ;;  %v1638_v1 = vpop.f32.mrf.mxu1 }
 0x41c   : > { %v4052_v2 = vpop.eup %4051  ;;  %v1639_v3 = vadd.f32 %v5004_v32, %v1638_v1  ;;  %3494 = vmatprep.mubr.f32.mxu0 %v4050_v63 }
 0x41d   : > { %v3431_v4 = vpop.f32.mrf.mxu1  ;;  %3495 = vmatmul.mubr.f32.gmra.mxu0 %v4052_v2 }
 0x41e   : > { %4065 = vtanh.f32 %v1639_v3  ;;  %v1654_v6 = vadd.f32 %v3431_v4, %v5004_v32  ;;  %v2051_v3 = vld [vmem:[#allocation13 + $0x10] sm:$0xff]  ;;  %v2050_v4 = vld [vmem:[#allocation13 + $0x8] sm:$0xff] }
 0x41f   : > { %v4054_v5 = vpop.eup %4053  ;;  %4067 = vtanh.f32 %v1644_v0  ;;  %v1648_v8 = vpop.f32.mrf.mxu1 }
 0x420   : > { %v4056_v9 = vpop.eup %4055  ;;  %v1649_v10 = vadd.f32 %v5004_v32, %v1648_v8  ;;  %3497 = vmatprep.mubr.f32.mxu0 %v4054_v5  ;;  %v2049_v5 = vld [vmem:[#allocation13] sm:$0xff]  ;;  %v2343_v8 = vld [vmem:[#allocation14 + $0x70] sm:$0xff] }
 0x421   : > { %v3434_v11 = vpop.f32.mrf.mxu1  ;;  %3498 = vmatmul.mubr.f32.gmra.mxu0 %v4056_v9  ;;  %v2342_v9 = vld [vmem:[#allocation14 + $0x68] sm:$0xff] }
 0x422   : > { %4069 = vtanh.f32 %v1649_v10  ;;  %v1664_v13 = vadd.f32 %v3434_v11, %v5004_v32  ;;  %v2341_v10 = vld [vmem:[#allocation14 + $0x60] sm:$0xff]  ;;  %v2340_v11 = vld [vmem:[#allocation14 + $0x58] sm:$0xff] }
 0x423   : > { %v4058_v12 = vpop.eup %4057  ;;  %4071 = vtanh.f32 %v1654_v6  ;;  %v1658_v14 = vpop.f32.mrf.mxu1  ;;  %v2344_v6 = vld [vmem:[#allocation14 + $0x78] sm:$0xff] }
 0x424   : > { %v4060_v15 = vpop.eup %4059  ;;  %v1659_v16 = vadd.f32 %v5004_v32, %v1658_v14  ;;  %3500 = vmatprep.mubr.f32.mxu0 %v4058_v12  ;;  %3616 = vmatprep.subr.mxu0 %v2344_v6  ;;  %v2339_v12 = vld [vmem:[#allocation14 + $0x50] sm:$0xff]  ;;  %v2337_v14 = vld [vmem:[#allocation14 + $0x40] sm:$0xff] }
 0x425   : > { %v3437_v17 = vpop.f32.mrf.mxu1  ;;  %3501 = vmatmul.mubr.f32.gmra.mxu0 %v4060_v15  ;;  %v2336_v15 = vld [vmem:[#allocation14 + $0x38] sm:$0xff] }
 0x426   : > { %4073 = vtanh.f32 %v1659_v16  ;;  %v1674_v18 = vadd.f32 %v3437_v17, %v5004_v32  ;;  %3617 = vmatpush3.msra.mxu0 %v2344_v6  ;;  %v2335_v16 = vld [vmem:[#allocation14 + $0x30] sm:$0xff]  ;;  %v2334_v17 = vld [vmem:[#allocation14 + $0x28] sm:$0xff] }
 0x427   : > { %v4062_v46 = vpop.eup %4061  ;;  %4075 = vtanh.f32 %v1664_v13  ;;  %v1668_v19 = vpop.f32.mrf.mxu1  ;;  %3618 = vmatprep.subr.mxu0 %v2343_v8  ;;  %v2338_v13 = vld [vmem:[#allocation14 + $0x48] sm:$0xff] }
 0x428   : > { %v4064_v20 = vpop.eup %4063  ;;  %v1669_v21 = vadd.f32 %v5004_v32, %v1668_v19  ;;  %3503 = vmatprep.mubr.f32.mxu0 %v4062_v46  ;;  %3619 = vmatpush3.msra.mxu0 %v2343_v8  ;;  %v2333_v46 = vld [vmem:[#allocation14 + $0x20] sm:$0xff] }
 0x429   : > { %v3440_v22 = vpop.f32.mrf.mxu1  ;;  %3504 = vmatmul.mubr.f32.gmra.mxu0 %v4064_v20  ;;  %3620 = vmatprep.subr.mxu0 %v2342_v9 }
 0x42a   : > { %4077 = vtanh.f32 %v1669_v21  ;;  %v1684_v24 = vadd.f32 %v3440_v22, %v5004_v32  ;;  %3621 = vmatpush3.msra.mxu0 %v2342_v9 }
 0x42b   : > { %v4066_v23 = vpop.eup %4065  ;;  %4079 = vtanh.f32 %v1674_v18  ;;  %v1678_v25 = vpop.f32.mrf.mxu1  ;;  %3622 = vmatprep.subr.mxu0 %v2341_v10  ;;  %v5041_v18 = vld [vmem:[%s5245_s10] ss:$0 sm:$0xff] }
 0x42c   : > { %v4068_v26 = vpop.eup %4067  ;;  %v1679_v27 = vadd.f32 %v5004_v32, %v1678_v25  ;;  %3506 = vmatprep.mubr.f32.mxu0 %v4066_v23  ;;  %3623 = vmatpush3.msra.mxu0 %v2341_v10 }
 0x42d   : > { %v3443_v28 = vpop.f32.mrf.mxu1  ;;  %3507 = vmatmul.mubr.f32.gmra.mxu0 %v4068_v26  ;;  %3624 = vmatprep.subr.mxu0 %v2340_v11 }
 0x42e   : > { %4081 = vtanh.f32 %v1679_v27  ;;  %v1694_v30 = vadd.f32 %v3443_v28, %v5004_v32  ;;  %3625 = vmatpush3.msra.mxu0 %v2340_v11 }
 0x42f   : > { %v4070_v29 = vpop.eup %4069  ;;  %4083 = vtanh.f32 %v1684_v24  ;;  %v1688_v31 = vpop.f32.mrf.mxu1  ;;  %3626 = vmatprep.subr.mxu0 %v2339_v12 }
 0x430   : > { %v4072_v61 = vpop.eup %4071  ;;  %v1689_v33 = vadd.f32 %v5004_v32, %v1688_v31  ;;  %3509 = vmatprep.mubr.f32.mxu0 %v4070_v29  ;;  %3627 = vmatpush3.msra.mxu0 %v2339_v12 }
 0x431   : > { %v3446_v34 = vpop.f32.mrf.mxu1  ;;  %3510 = vmatmul.mubr.f32.gmra.mxu0 %v4072_v61  ;;  %3628 = vmatprep.subr.mxu0 %v2338_v13 }
 0x432   : > { %4085 = vtanh.f32 %v1689_v33  ;;  %v1704_v36 = vadd.f32 %v3446_v34, %v5004_v32  ;;  %3629 = vmatpush3.msra.mxu0 %v2338_v13 }
 0x433   : > { %v4074_v35 = vpop.eup %4073  ;;  %4087 = vtanh.f32 %v1694_v30  ;;  %v1698_v37 = vpop.f32.mrf.mxu1  ;;  %3630 = vmatprep.subr.mxu0 %v2337_v14 }
 0x434   : > { %v4076_v38 = vpop.eup %4075  ;;  %v1699_v39 = vadd.f32 %v5004_v32, %v1698_v37  ;;  %3512 = vmatprep.mubr.f32.mxu0 %v4074_v35  ;;  %3631 = vmatpush3.msra.mxu0 %v2337_v14 }
 0x435   : > { %v3449_v40 = vpop.f32.mrf.mxu1  ;;  %3513 = vmatmul.mubr.f32.gmra.mxu0 %v4076_v38  ;;  %3632 = vmatprep.subr.mxu0 %v2336_v15 }
 0x436   : > { %4089 = vtanh.f32 %v1699_v39  ;;  %v1714_v7 = vadd.f32 %v3449_v40, %v5004_v32  ;;  %3633 = vmatpush3.msra.mxu0 %v2336_v15 }
 0x437   : > { %v4078_v41 = vpop.eup %4077  ;;  %4091 = vtanh.f32 %v1704_v36  ;;  %v1708_v42 = vpop.f32.mrf.mxu1  ;;  %3634 = vmatprep.subr.mxu0 %v2335_v16 }
 0x438   : > { %v4080_v43 = vpop.eup %4079  ;;  %v1709_v44 = vadd.f32 %v5004_v32, %v1708_v42  ;;  %3515 = vmatprep.mubr.f32.mxu0 %v4078_v41  ;;  %3635 = vmatpush3.msra.mxu0 %v2335_v16 }
 0x439   : > { %v3452_v45 = vpop.f32.mrf.mxu1  ;;  %3516 = vmatmul.mubr.f32.gmra.mxu0 %v4080_v43  ;;  %3636 = vmatprep.subr.mxu0 %v2334_v17 }
 0x43a   : > { %4093 = vtanh.f32 %v1709_v44  ;;  %v1724_v48 = vadd.f32 %v3452_v45, %v5004_v32  ;;  %3637 = vmatpush3.msra.mxu0 %v2334_v17 }
 0x43b   : > { %v4082_v47 = vpop.eup %4081  ;;  %4095 = vtanh.f32 %v1714_v7  ;;  %v1718_v49 = vpop.f32.mrf.mxu1  ;;  %3638 = vmatprep.subr.mxu0 %v2333_v46 }
 0x43c   : > { %v4084_v50 = vpop.eup %4083  ;;  %v1719_v51 = vadd.f32 %v5004_v32, %v1718_v49  ;;  %3518 = vmatprep.mubr.f32.mxu0 %v4082_v47  ;;  %3639 = vmatpush3.msra.mxu0 %v2333_v46 }
 0x43d   : > { %v3455_v52 = vpop.f32.mrf.mxu1  ;;  %3519 = vmatmul.mubr.f32.gmra.mxu0 %v4084_v50 }
 0x43e   : > { %4097 = vtanh.f32 %v1719_v51  ;;  %v1734_v54 = vadd.f32 %v3455_v52, %v5004_v32 }
 0x43f   : > { %v4086_v53 = vpop.eup %4085  ;;  %4099 = vtanh.f32 %v1724_v48  ;;  %v1728_v55 = vpop.f32.mrf.mxu1 }
 0x440   : > { %v4088_v56 = vpop.eup %4087  ;;  %v1729_v57 = vadd.f32 %v5004_v32, %v1728_v55  ;;  %3521 = vmatprep.mubr.f32.mxu0 %v4086_v53  ;;  %v2052_v32 = vld [vmem:[#allocation13 + $0x18] sm:$0xff] }
 0x441   : > { %3522 = vmatmul.mubr.f32.gmra.mxu0 %v4088_v56  ;;  %3560 = vmatprep.subr.mxu1 %v2052_v32 }
 0x442   : > { %4101 = vtanh.f32 %v1729_v57  ;;  %3561 = vmatpush3.msra.mxu1 %v2052_v32 }
 0x443   : > { %v4090_v58 = vpop.eup %4089  ;;  %4103 = vtanh.f32 %v1734_v54  ;;  %3562 = vmatprep.subr.mxu1 %v2051_v3 }
 0x444   : > { %v4092_v59 = vpop.eup %4091  ;;  %3524 = vmatprep.mubr.f32.mxu0 %v4090_v58  ;;  %3563 = vmatpush3.msra.mxu1 %v2051_v3 }
 0x445   : > { %3525 = vmatmul.mubr.f32.gmra.mxu0 %v4092_v59  ;;  %3564 = vmatprep.subr.mxu1 %v2050_v4 }
 0x446   : > { %3565 = vmatpush3.msra.mxu1 %v2050_v4 }
 0x447   : > { %v4094_v60 = vpop.eup %4093  ;;  %3566 = vmatprep.subr.mxu1 %v2049_v5 }
 0x448   : > { %v4096_v62 = vpop.eup %4095  ;;  %3527 = vmatprep.mubr.f32.mxu0 %v4094_v60  ;;  %3567 = vmatpush3.msra.mxu1 %v2049_v5 }
 0x449   : > { %3528 = vmatmul.mubr.f32.gmra.mxu0 %v4096_v62 }
 0x44b   : > { %v4098_v63 = vpop.eup %4097 }
 0x44c   : > { %v4100_v0 = vpop.eup %4099  ;;  %3530 = vmatprep.mubr.f32.mxu0 %v4098_v63 }
 0x44d   : > { %3531 = vmatmul.mubr.f32.gmra.mxu0 %v4100_v0 }
 0x44f   : > { %v4102_v1 = vpop.eup %4101 }
 0x450   : > { %v4104_v2 = vpop.eup %4103  ;;  %3533 = vmatprep.mubr.f32.mxu0 %v4102_v1 }
 0x451   : > { %3534 = vmatmul.mubr.f32.gmra.mxu0 %v4104_v2 }
 0x4d5   : > { %v3490_v19 = vpop.f32.mrf.mxu0 }
 0x4d6   : > { %v1864_v20 = vadd.f32 %v3490_v19, %v5041_v18 }
 0x4d7   : > { %v1858_v21 = vpop.f32.mrf.mxu0 }
 0x4d8   : > { %v1859_v22 = vadd.f32 %v5041_v18, %v1858_v21 }
 0x4d9   : > { %v3493_v23 = vpop.f32.mrf.mxu0 }
 0x4da   : > { %4105 = vtanh.f32 %v1859_v22  ;;  %v1874_v24 = vadd.f32 %v3493_v23, %v5041_v18 }
 0x4db   : > { %4107 = vtanh.f32 %v1864_v20  ;;  %v1868_v25 = vpop.f32.mrf.mxu0 }
 0x4dc   : > { %v1869_v26 = vadd.f32 %v5041_v18, %v1868_v25 }
 0x4dd   : > { %v3496_v27 = vpop.f32.mrf.mxu0 }
 0x4de   : > { %4109 = vtanh.f32 %v1869_v26  ;;  %v1884_v28 = vadd.f32 %v3496_v27, %v5041_v18 }
 0x4df   : > { %4111 = vtanh.f32 %v1874_v24  ;;  %v1878_v29 = vpop.f32.mrf.mxu0 }
 0x4e0   : > { %v1879_v30 = vadd.f32 %v5041_v18, %v1878_v29 }
 0x4e1   : > { %v3499_v31 = vpop.f32.mrf.mxu0 }
 0x4e2   : > { %4113 = vtanh.f32 %v1879_v30  ;;  %v1894_v61 = vadd.f32 %v3499_v31, %v5041_v18 }
 0x4e3   : > { %4115 = vtanh.f32 %v1884_v28  ;;  %v1888_v33 = vpop.f32.mrf.mxu0 }
 0x4e4   : > { %v1889_v34 = vadd.f32 %v5041_v18, %v1888_v33 }
 0x4e5   : > { %v3502_v35 = vpop.f32.mrf.mxu0 }
 0x4e6   : > { %4117 = vtanh.f32 %v1889_v34  ;;  %v1904_v37 = vadd.f32 %v3502_v35, %v5041_v18 }
 0x4e7   : > { %v4106_v36 = vpop.eup %4105  ;;  %4119 = vtanh.f32 %v1894_v61  ;;  %v1898_v38 = vpop.f32.mrf.mxu0 }
 0x4e8   : > { %v4108_v39 = vpop.eup %4107  ;;  %v1899_v40 = vadd.f32 %v5041_v18, %v1898_v38  ;;  %3568 = vmatprep.mubr.f32.mxu1 %v4106_v36 }
 0x4e9   : > { %v3505_v41 = vpop.f32.mrf.mxu0  ;;  %3569 = vmatmul.mubr.f32.vlgmr.msra.gmra.mxu1 %v4108_v39 }
 0x4ea   : > { %4121 = vtanh.f32 %v1899_v40  ;;  %v1914_v42 = vadd.f32 %v3505_v41, %v5041_v18 }
 0x4eb   : > { %v4110_v7 = vpop.eup %4109  ;;  %4123 = vtanh.f32 %v1904_v37  ;;  %v1908_v43 = vpop.f32.mrf.mxu0 }
 0x4ec   : > { %v4112_v44 = vpop.eup %4111  ;;  %v1909_v45 = vadd.f32 %v5041_v18, %v1908_v43  ;;  %3571 = vmatprep.mubr.f32.mxu1 %v4110_v7 }
 0x4ed   : > { %v3508_v47 = vpop.f32.mrf.mxu0  ;;  %3572 = vmatmul.mubr.f32.gmra.mxu1 %v4112_v44 }
 0x4ee   : > { %4125 = vtanh.f32 %v1909_v45  ;;  %v1924_v49 = vadd.f32 %v3508_v47, %v5041_v18 }
 0x4ef   : > { %v4114_v48 = vpop.eup %4113  ;;  %4127 = vtanh.f32 %v1914_v42  ;;  %v1918_v50 = vpop.f32.mrf.mxu0 }
 0x4f0   : > { %v4116_v51 = vpop.eup %4115  ;;  %v1919_v52 = vadd.f32 %v5041_v18, %v1918_v50  ;;  %3574 = vmatprep.mubr.f32.mxu1 %v4114_v48 }
 0x4f1   : > { %v3511_v53 = vpop.f32.mrf.mxu0  ;;  %3575 = vmatmul.mubr.f32.gmra.mxu1 %v4116_v51 }
 0x4f2   : > { %4129 = vtanh.f32 %v1919_v52  ;;  %v1934_v55 = vadd.f32 %v3511_v53, %v5041_v18  ;;  %v2331_v52 = vld [vmem:[#allocation14 + $0x10] sm:$0xff]  ;;  %v2330_v53 = vld [vmem:[#allocation14 + $0x8] sm:$0xff] }
 0x4f3   : > { %v4118_v54 = vpop.eup %4117  ;;  %4131 = vtanh.f32 %v1924_v49  ;;  %v1928_v56 = vpop.f32.mrf.mxu0 }
 0x4f4   : > { %v4120_v57 = vpop.eup %4119  ;;  %v1929_v58 = vadd.f32 %v5041_v18, %v1928_v56  ;;  %3577 = vmatprep.mubr.f32.mxu1 %v4118_v54  ;;  %v2329_v54 = vld [vmem:[#allocation14] sm:$0xff] }
 0x4f5   : > { %v3514_v59 = vpop.f32.mrf.mxu0  ;;  %3578 = vmatmul.mubr.f32.gmra.mxu1 %v4120_v57 }
 0x4f6   : > { %4133 = vtanh.f32 %v1929_v58  ;;  %v1944_v62 = vadd.f32 %v3514_v59, %v5041_v18 }
 0x4f7   : > { %v4122_v60 = vpop.eup %4121  ;;  %4135 = vtanh.f32 %v1934_v55  ;;  %v1938_v63 = vpop.f32.mrf.mxu0  ;;  %v5078_v55 = vld [vmem:[%s5247_s12] ss:$0 sm:$0xff] }
 0x4f8   : > { %v4124_v0 = vpop.eup %4123  ;;  %v1939_v1 = vadd.f32 %v5041_v18, %v1938_v63  ;;  %3580 = vmatprep.mubr.f32.mxu1 %v4122_v60 }
 0x4f9   : > { %v3517_v2 = vpop.f32.mrf.mxu0  ;;  %3581 = vmatmul.mubr.f32.gmra.mxu1 %v4124_v0 }
 0x4fa   : > { %4137 = vtanh.f32 %v1939_v1  ;;  %v1954_v3 = vadd.f32 %v3517_v2, %v5041_v18 }
 0x4fb   : > { %v4126_v32 = vpop.eup %4125  ;;  %4139 = vtanh.f32 %v1944_v62  ;;  %v1948_v4 = vpop.f32.mrf.mxu0 }
 0x4fc   : > { %v4128_v5 = vpop.eup %4127  ;;  %v1949_v6 = vadd.f32 %v5041_v18, %v1948_v4  ;;  %3583 = vmatprep.mubr.f32.mxu1 %v4126_v32 }
 0x4fd   : > { %v3520_v8 = vpop.f32.mrf.mxu0  ;;  %3584 = vmatmul.mubr.f32.gmra.mxu1 %v4128_v5 }
 0x4fe   : > { %4141 = vtanh.f32 %v1949_v6  ;;  %v1964_v10 = vadd.f32 %v3520_v8, %v5041_v18 }
 0x4ff   : > { %v4130_v9 = vpop.eup %4129  ;;  %4143 = vtanh.f32 %v1954_v3  ;;  %v1958_v11 = vpop.f32.mrf.mxu0 }
 0x500   : > { %v4132_v12 = vpop.eup %4131  ;;  %v1959_v13 = vadd.f32 %v5041_v18, %v1958_v11  ;;  %3586 = vmatprep.mubr.f32.mxu1 %v4130_v9 }
 0x501   : > { %v3523_v14 = vpop.f32.mrf.mxu0  ;;  %3587 = vmatmul.mubr.f32.gmra.mxu1 %v4132_v12 }
 0x502   : > { %4145 = vtanh.f32 %v1959_v13  ;;  %v1974_v16 = vadd.f32 %v3523_v14, %v5041_v18 }
 0x503   : > { %v4134_v15 = vpop.eup %4133  ;;  %4147 = vtanh.f32 %v1964_v10  ;;  %v1968_v17 = vpop.f32.mrf.mxu0 }
 0x504   : > { %v4136_v46 = vpop.eup %4135  ;;  %v1969_v19 = vadd.f32 %v5041_v18, %v1968_v17  ;;  %3589 = vmatprep.mubr.f32.mxu1 %v4134_v15 }
 0x505   : > { %v3526_v20 = vpop.f32.mrf.mxu0  ;;  %3590 = vmatmul.mubr.f32.gmra.mxu1 %v4136_v46 }
 0x506   : > { %4149 = vtanh.f32 %v1969_v19  ;;  %v1984_v22 = vadd.f32 %v3526_v20, %v5041_v18 }
 0x507   : > { %v4138_v21 = vpop.eup %4137  ;;  %4151 = vtanh.f32 %v1974_v16  ;;  %v1978_v23 = vpop.f32.mrf.mxu0 }
 0x508   : > { %v4140_v24 = vpop.eup %4139  ;;  %v1979_v25 = vadd.f32 %v5041_v18, %v1978_v23  ;;  %3592 = vmatprep.mubr.f32.mxu1 %v4138_v21 }
 0x509   : > { %v3529_v26 = vpop.f32.mrf.mxu0  ;;  %3593 = vmatmul.mubr.f32.gmra.mxu1 %v4140_v24 }
 0x50a   : > { %4153 = vtanh.f32 %v1979_v25  ;;  %v1994_v28 = vadd.f32 %v3529_v26, %v5041_v18 }
 0x50b   : > { %v4142_v27 = vpop.eup %4141  ;;  %4155 = vtanh.f32 %v1984_v22  ;;  %v1988_v29 = vpop.f32.mrf.mxu0 }
 0x50c   : > { %v4144_v30 = vpop.eup %4143  ;;  %v1989_v31 = vadd.f32 %v5041_v18, %v1988_v29  ;;  %3595 = vmatprep.mubr.f32.mxu1 %v4142_v27 }
 0x50d   : > { %v3532_v61 = vpop.f32.mrf.mxu0  ;;  %3596 = vmatmul.mubr.f32.gmra.mxu1 %v4144_v30 }
 0x50e   : > { %4157 = vtanh.f32 %v1989_v31  ;;  %v2004_v34 = vadd.f32 %v3532_v61, %v5041_v18 }
 0x50f   : > { %v4146_v33 = vpop.eup %4145  ;;  %4159 = vtanh.f32 %v1994_v28  ;;  %v1998_v35 = vpop.f32.mrf.mxu0 }
 0x510   : > { %v4148_v36 = vpop.eup %4147  ;;  %v1999_v37 = vadd.f32 %v5041_v18, %v1998_v35  ;;  %3598 = vmatprep.mubr.f32.mxu1 %v4146_v33 }
 0x511   : > { %v3535_v38 = vpop.f32.mrf.mxu0  ;;  %3599 = vmatmul.mubr.f32.gmra.mxu1 %v4148_v36 }
 0x512   : > { %4161 = vtanh.f32 %v1999_v37  ;;  %v2014_v40 = vadd.f32 %v3535_v38, %v5041_v18 }
 0x513   : > { %v4150_v39 = vpop.eup %4149  ;;  %4163 = vtanh.f32 %v2004_v34  ;;  %v2008_v41 = vpop.f32.mrf.mxu0 }
 0x514   : > { %v4152_v7 = vpop.eup %4151  ;;  %v2009_v42 = vadd.f32 %v5041_v18, %v2008_v41  ;;  %3601 = vmatprep.mubr.f32.mxu1 %v4150_v39  ;;  %v2332_v18 = vld [vmem:[#allocation14 + $0x18] sm:$0xff] }
 0x515   : > { %3602 = vmatmul.mubr.f32.gmra.mxu1 %v4152_v7  ;;  %3640 = vmatprep.subr.mxu0 %v2332_v18 }
 0x516   : > { %4165 = vtanh.f32 %v2009_v42  ;;  %3641 = vmatpush3.msra.mxu0 %v2332_v18 }
 0x517   : > { %v4154_v43 = vpop.eup %4153  ;;  %4167 = vtanh.f32 %v2014_v40  ;;  %3642 = vmatprep.subr.mxu0 %v2331_v52 }
 0x518   : > { %v4156_v44 = vpop.eup %4155  ;;  %3604 = vmatprep.mubr.f32.mxu1 %v4154_v43  ;;  %3643 = vmatpush3.msra.mxu0 %v2331_v52 }
 0x519   : > { %3605 = vmatmul.mubr.f32.gmra.mxu1 %v4156_v44  ;;  %3644 = vmatprep.subr.mxu0 %v2330_v53 }
 0x51a   : > { %3645 = vmatpush3.msra.mxu0 %v2330_v53 }
 0x51b   : > { %v4158_v45 = vpop.eup %4157  ;;  %3646 = vmatprep.subr.mxu0 %v2329_v54 }
 0x51c   : > { %v4160_v47 = vpop.eup %4159  ;;  %3607 = vmatprep.mubr.f32.mxu1 %v4158_v45  ;;  %3647 = vmatpush3.msra.mxu0 %v2329_v54 }
 0x51d   : > { %3608 = vmatmul.mubr.f32.gmra.mxu1 %v4160_v47 }
 0x51f   : > { %v4162_v48 = vpop.eup %4161 }
 0x520   : > { %v4164_v49 = vpop.eup %4163  ;;  %3610 = vmatprep.mubr.f32.mxu1 %v4162_v48 }
 0x521   : > { %3611 = vmatmul.mubr.f32.gmra.mxu1 %v4164_v49 }
 0x523   : > { %v4166_v50 = vpop.eup %4165 }
 0x524   : > { %v4168_v51 = vpop.eup %4167  ;;  %3613 = vmatprep.mubr.f32.mxu1 %v4166_v50 }
 0x525   : > { %3614 = vmatmul.mubr.f32.gmra.mxu1 %v4168_v51 }
 0x5a9   : > { %v3570_v56 = vpop.f32.mrf.mxu1 }
 0x5aa   : > { %v2144_v57 = vadd.f32 %v3570_v56, %v5078_v55 }
 0x5ab   : > { %v2138_v58 = vpop.f32.mrf.mxu1 }
 0x5ac   : > { %v2139_v59 = vadd.f32 %v5078_v55, %v2138_v58 }
 0x5ad   : > { %v3573_v60 = vpop.f32.mrf.mxu1 }
 0x5ae   : > { %4169 = vtanh.f32 %v2139_v59  ;;  %v2154_v62 = vadd.f32 %v3573_v60, %v5078_v55 }
 0x5af   : > { %4171 = vtanh.f32 %v2144_v57  ;;  %v2148_v63 = vpop.f32.mrf.mxu1 }
 0x5b0   : > { %v2149_v0 = vadd.f32 %v5078_v55, %v2148_v63 }
 0x5b1   : > { %v3576_v1 = vpop.f32.mrf.mxu1 }
 0x5b2   : > { %4173 = vtanh.f32 %v2149_v0  ;;  %v2164_v2 = vadd.f32 %v3576_v1, %v5078_v55 }
 0x5b3   : > { %4175 = vtanh.f32 %v2154_v62  ;;  %v2158_v32 = vpop.f32.mrf.mxu1 }
 0x5b4   : > { %v2159_v3 = vadd.f32 %v5078_v55, %v2158_v32 }
 0x5b5   : > { %v3579_v4 = vpop.f32.mrf.mxu1 }
 0x5b6   : > { %4177 = vtanh.f32 %v2159_v3  ;;  %v2174_v5 = vadd.f32 %v3579_v4, %v5078_v55 }
 0x5b7   : > { %4179 = vtanh.f32 %v2164_v2  ;;  %v2168_v6 = vpop.f32.mrf.mxu1 }
 0x5b8   : > { %v2169_v8 = vadd.f32 %v5078_v55, %v2168_v6 }
 0x5b9   : > { %v3582_v9 = vpop.f32.mrf.mxu1 }
 0x5ba   : > { %4181 = vtanh.f32 %v2169_v8  ;;  %v2184_v11 = vadd.f32 %v3582_v9, %v5078_v55 }
 0x5bb   : > { %v4170_v10 = vpop.eup %4169  ;;  %4183 = vtanh.f32 %v2174_v5  ;;  %v2178_v12 = vpop.f32.mrf.mxu1 }
 0x5bc   : > { %v4172_v13 = vpop.eup %4171  ;;  %v2179_v14 = vadd.f32 %v5078_v55, %v2178_v12  ;;  %3648 = vmatprep.mubr.f32.mxu0 %v4170_v10 }
 0x5bd   : > { %v3585_v15 = vpop.f32.mrf.mxu1  ;;  %3649 = vmatmul.mubr.f32.vlgmr.msra.gmra.mxu0 %v4172_v13 }
 0x5be   : > { %4185 = vtanh.f32 %v2179_v14  ;;  %v2194_v17 = vadd.f32 %v3585_v15, %v5078_v55 }
 0x5bf   : > { %v4174_v16 = vpop.eup %4173  ;;  %4187 = vtanh.f32 %v2184_v11  ;;  %v2188_v46 = vpop.f32.mrf.mxu1 }
 0x5c0   : > { %v4176_v19 = vpop.eup %4175  ;;  %v2189_v20 = vadd.f32 %v5078_v55, %v2188_v46  ;;  %3651 = vmatprep.mubr.f32.mxu0 %v4174_v16 }
 0x5c1   : > { %v3588_v21 = vpop.f32.mrf.mxu1  ;;  %3652 = vmatmul.mubr.f32.gmra.mxu0 %v4176_v19 }
 0x5c2   : > { %4189 = vtanh.f32 %v2189_v20  ;;  %v2204_v23 = vadd.f32 %v3588_v21, %v5078_v55 }
 0x5c3   : > { %v4178_v22 = vpop.eup %4177  ;;  %4191 = vtanh.f32 %v2194_v17  ;;  %v2198_v24 = vpop.f32.mrf.mxu1 }
 0x5c4   : > { %v4180_v25 = vpop.eup %4179  ;;  %v2199_v26 = vadd.f32 %v5078_v55, %v2198_v24  ;;  %3654 = vmatprep.mubr.f32.mxu0 %v4178_v22 }
 0x5c5   : > { %v3591_v27 = vpop.f32.mrf.mxu1  ;;  %3655 = vmatmul.mubr.f32.gmra.mxu0 %v4180_v25 }
 0x5c6   : > { %4193 = vtanh.f32 %v2199_v26  ;;  %v2214_v29 = vadd.f32 %v3591_v27, %v5078_v55 }
 0x5c7   : > { %v4182_v28 = vpop.eup %4181  ;;  %4195 = vtanh.f32 %v2204_v23  ;;  %v2208_v30 = vpop.f32.mrf.mxu1 }
 0x5c8   : > { %v4184_v31 = vpop.eup %4183  ;;  %v2209_v61 = vadd.f32 %v5078_v55, %v2208_v30  ;;  %3657 = vmatprep.mubr.f32.mxu0 %v4182_v28 }
 0x5c9   : > { %v3594_v33 = vpop.f32.mrf.mxu1  ;;  %3658 = vmatmul.mubr.f32.gmra.mxu0 %v4184_v31 }
 0x5ca   : > { %4197 = vtanh.f32 %v2209_v61  ;;  %v2224_v35 = vadd.f32 %v3594_v33, %v5078_v55 }
 0x5cb   : > { %v4186_v34 = vpop.eup %4185  ;;  %4199 = vtanh.f32 %v2214_v29  ;;  %v2218_v36 = vpop.f32.mrf.mxu1 }
 0x5cc   : > { %v4188_v37 = vpop.eup %4187  ;;  %v2219_v38 = vadd.f32 %v5078_v55, %v2218_v36  ;;  %3660 = vmatprep.mubr.f32.mxu0 %v4186_v34 }
 0x5cd   : > { %v3597_v39 = vpop.f32.mrf.mxu1  ;;  %3661 = vmatmul.mubr.f32.gmra.mxu0 %v4188_v37 }
 0x5ce   : > { %4201 = vtanh.f32 %v2219_v38  ;;  %v2234_v41 = vadd.f32 %v3597_v39, %v5078_v55 }
 0x5cf   : > { %v4190_v40 = vpop.eup %4189  ;;  %4203 = vtanh.f32 %v2224_v35  ;;  %v2228_v7 = vpop.f32.mrf.mxu1 }
 0x5d0   : > { %v4192_v42 = vpop.eup %4191  ;;  %v2229_v43 = vadd.f32 %v5078_v55, %v2228_v7  ;;  %3663 = vmatprep.mubr.f32.mxu0 %v4190_v40 }
 0x5d1   : > { %v3600_v44 = vpop.f32.mrf.mxu1  ;;  %3664 = vmatmul.mubr.f32.gmra.mxu0 %v4192_v42 }
 0x5d2   : > { %4205 = vtanh.f32 %v2229_v43  ;;  %v2244_v47 = vadd.f32 %v3600_v44, %v5078_v55 }
 0x5d3   : > { %v4194_v45 = vpop.eup %4193  ;;  %4207 = vtanh.f32 %v2234_v41  ;;  %v2238_v48 = vpop.f32.mrf.mxu1 }
 0x5d4   : > { %v4196_v49 = vpop.eup %4195  ;;  %v2239_v50 = vadd.f32 %v5078_v55, %v2238_v48  ;;  %3666 = vmatprep.mubr.f32.mxu0 %v4194_v45 }
 0x5d5   : > { %v3603_v51 = vpop.f32.mrf.mxu1  ;;  %3667 = vmatmul.mubr.f32.gmra.mxu0 %v4196_v49 }
 0x5d6   : > { %4209 = vtanh.f32 %v2239_v50  ;;  %v2254_v52 = vadd.f32 %v3603_v51, %v5078_v55 }
 0x5d7   : > { %v4198_v18 = vpop.eup %4197  ;;  %4211 = vtanh.f32 %v2244_v47  ;;  %v2248_v53 = vpop.f32.mrf.mxu1 }
 0x5d8   : > { %v4200_v54 = vpop.eup %4199  ;;  %v2249_v56 = vadd.f32 %v5078_v55, %v2248_v53  ;;  %3669 = vmatprep.mubr.f32.mxu0 %v4198_v18 }
 0x5d9   : > { %v3606_v57 = vpop.f32.mrf.mxu1  ;;  %3670 = vmatmul.mubr.f32.gmra.mxu0 %v4200_v54 }
 0x5da   : > { %4213 = vtanh.f32 %v2249_v56  ;;  %v2264_v59 = vadd.f32 %v3606_v57, %v5078_v55 }
 0x5db   : > { %v4202_v58 = vpop.eup %4201  ;;  %4215 = vtanh.f32 %v2254_v52  ;;  %v2258_v60 = vpop.f32.mrf.mxu1 }
 0x5dc   : > { %v4204_v62 = vpop.eup %4203  ;;  %v2259_v63 = vadd.f32 %v5078_v55, %v2258_v60  ;;  %3672 = vmatprep.mubr.f32.mxu0 %v4202_v58 }
 0x5dd   : > { %v3609_v0 = vpop.f32.mrf.mxu1  ;;  %3673 = vmatmul.mubr.f32.gmra.mxu0 %v4204_v62 }
 0x5de   : > { %4217 = vtanh.f32 %v2259_v63  ;;  %v2274_v2 = vadd.f32 %v3609_v0, %v5078_v55 }
 0x5df   : > { %v4206_v1 = vpop.eup %4205  ;;  %4219 = vtanh.f32 %v2264_v59  ;;  %v2268_v32 = vpop.f32.mrf.mxu1 }
 0x5e0   : > { %v4208_v3 = vpop.eup %4207  ;;  %v2269_v4 = vadd.f32 %v5078_v55, %v2268_v32  ;;  %3675 = vmatprep.mubr.f32.mxu0 %v4206_v1 }
 0x5e1   : > { %v3612_v5 = vpop.f32.mrf.mxu1  ;;  %3676 = vmatmul.mubr.f32.gmra.mxu0 %v4208_v3 }
 0x5e2   : > { %4221 = vtanh.f32 %v2269_v4  ;;  %v2284_v8 = vadd.f32 %v3612_v5, %v5078_v55 }
 0x5e3   : > { %v4210_v6 = vpop.eup %4209  ;;  %4223 = vtanh.f32 %v2274_v2  ;;  %v2278_v9 = vpop.f32.mrf.mxu1 }
 0x5e4   : > { %v4212_v10 = vpop.eup %4211  ;;  %v2279_v11 = vadd.f32 %v5078_v55, %v2278_v9  ;;  %3678 = vmatprep.mubr.f32.mxu0 %v4210_v6 }
 0x5e5   : > { %v3615_v12 = vpop.f32.mrf.mxu1  ;;  %3679 = vmatmul.mubr.f32.gmra.mxu0 %v4212_v10 }
 0x5e6   : > { %4225 = vtanh.f32 %v2279_v11  ;;  %v2294_v14 = vadd.f32 %v3615_v12, %v5078_v55 }
 0x5e7   : > { %v4214_v13 = vpop.eup %4213  ;;  %4227 = vtanh.f32 %v2284_v8  ;;  %v2288_v15 = vpop.f32.mrf.mxu1 }
 0x5e8   : > { %v4216_v16 = vpop.eup %4215  ;;  %v2289_v17 = vadd.f32 %v5078_v55, %v2288_v15  ;;  %3681 = vmatprep.mubr.f32.mxu0 %v4214_v13  ;;  %v5115_v55 = vld [vmem:[%s5293_s7] ss:$0 sm:$0xff] }
 0x5e9   : > { %3682 = vmatmul.mubr.f32.gmra.mxu0 %v4216_v16 }
 0x5ea   : > { %4229 = vtanh.f32 %v2289_v17 }
 0x5eb   : > { %v4218_v46 = vpop.eup %4217  ;;  %4231 = vtanh.f32 %v2294_v14 }
 0x5ec   : > { %v4220_v19 = vpop.eup %4219  ;;  %3684 = vmatprep.mubr.f32.mxu0 %v4218_v46 }
 0x5ed   : > { %3685 = vmatmul.mubr.f32.gmra.mxu0 %v4220_v19 }
 0x5ef   : > { %v4222_v20 = vpop.eup %4221 }
 0x5f0   : > { %v4224_v21 = vpop.eup %4223  ;;  %3687 = vmatprep.mubr.f32.mxu0 %v4222_v20 }
 0x5f1   : > { %3688 = vmatmul.mubr.f32.gmra.mxu0 %v4224_v21 }
 0x5f3   : > { %v4226_v22 = vpop.eup %4225 }
 0x5f4   : > { %v4228_v23 = vpop.eup %4227  ;;  %3690 = vmatprep.mubr.f32.mxu0 %v4226_v22 }
 0x5f5   : > { %3691 = vmatmul.mubr.f32.gmra.mxu0 %v4228_v23 }
 0x5f7   : > { %v4230_v24 = vpop.eup %4229 }
 0x5f8   : > { %v4232_v25 = vpop.eup %4231  ;;  %3693 = vmatprep.mubr.f32.mxu0 %v4230_v24 }
 0x5f9   : > { %3694 = vmatmul.mubr.f32.gmra.mxu0 %v4232_v25 }
 0x67d   : > { %v3650_v26 = vpop.f32.mrf.mxu0 }
 0x67e   : > { %v2424_v27 = vadd.f32 %v3650_v26, %v5115_v55 }
 0x67f   : > { %v2418_v28 = vpop.f32.mrf.mxu0 }
 0x680   : > { %2578 = vst [vmem:[%s5120_s25 + $0x8] sm:$0xff] %v2424_v27  ;;  %v2419_v29 = vadd.f32 %v5115_v55, %v2418_v28 }
 0x681   : > { %v3653_v30 = vpop.f32.mrf.mxu0 }
 0x682   : > { %2577 = vst [vmem:[%s5120_s25] sm:$0xff] %v2419_v29  ;;  %v2434_v31 = vadd.f32 %v3653_v30, %v5115_v55 }
 0x683   : > { %v2428_v61 = vpop.f32.mrf.mxu0 }
 0x684   : > { %2580 = vst [vmem:[%s5120_s25 + $0x18] sm:$0xff] %v2434_v31  ;;  %v2429_v33 = vadd.f32 %v5115_v55, %v2428_v61 }
 0x685   : > { %v3656_v34 = vpop.f32.mrf.mxu0 }
 0x686   : > { %2579 = vst [vmem:[%s5120_s25 + $0x10] sm:$0xff] %v2429_v33  ;;  %v2444_v35 = vadd.f32 %v3656_v34, %v5115_v55 }
 0x687   : > { %v2438_v36 = vpop.f32.mrf.mxu0 }
 0x688   : > { %2582 = vst [vmem:[%s5120_s25 + $0x28] sm:$0xff] %v2444_v35  ;;  %v2439_v37 = vadd.f32 %v5115_v55, %v2438_v36 }
 0x689   : > { %v3659_v38 = vpop.f32.mrf.mxu0 }
 0x68a   : > { %2581 = vst [vmem:[%s5120_s25 + $0x20] sm:$0xff] %v2439_v37  ;;  %v2454_v39 = vadd.f32 %v3659_v38, %v5115_v55 }
 0x68b   : > { %v2448_v40 = vpop.f32.mrf.mxu0 }
 0x68c   : > { %2584 = vst [vmem:[%s5120_s25 + $0x38] sm:$0xff] %v2454_v39  ;;  %v2449_v41 = vadd.f32 %v5115_v55, %v2448_v40 }
 0x68d   : > { %v3662_v7 = vpop.f32.mrf.mxu0 }
 0x68e   : > { %2583 = vst [vmem:[%s5120_s25 + $0x30] sm:$0xff] %v2449_v41  ;;  %v2464_v42 = vadd.f32 %v3662_v7, %v5115_v55 }
 0x68f   : > { %v2458_v43 = vpop.f32.mrf.mxu0 }
 0x690   : > { %2586 = vst [vmem:[%s5120_s25 + $0x48] sm:$0xff] %v2464_v42  ;;  %v2459_v44 = vadd.f32 %v5115_v55, %v2458_v43 }
 0x691   : > { %v3665_v45 = vpop.f32.mrf.mxu0 }
 0x692   : > { %2585 = vst [vmem:[%s5120_s25 + $0x40] sm:$0xff] %v2459_v44  ;;  %v2474_v47 = vadd.f32 %v3665_v45, %v5115_v55 }
 0x693   : > { %v2468_v48 = vpop.f32.mrf.mxu0 }
 0x694   : > { %2588 = vst [vmem:[%s5120_s25 + $0x58] sm:$0xff] %v2474_v47  ;;  %v2469_v49 = vadd.f32 %v5115_v55, %v2468_v48 }
 0x695   : > { %v3668_v50 = vpop.f32.mrf.mxu0 }
 0x696   : > { %2587 = vst [vmem:[%s5120_s25 + $0x50] sm:$0xff] %v2469_v49  ;;  %v2484_v51 = vadd.f32 %v3668_v50, %v5115_v55 }
 0x697   : > { %v2478_v18 = vpop.f32.mrf.mxu0 }
 0x698   : > { %2590 = vst [vmem:[%s5120_s25 + $0x68] sm:$0xff] %v2484_v51  ;;  %v2479_v52 = vadd.f32 %v5115_v55, %v2478_v18 }
 0x699   : > { %v3671_v53 = vpop.f32.mrf.mxu0 }
 0x69a   : > { %2589 = vst [vmem:[%s5120_s25 + $0x60] sm:$0xff] %v2479_v52  ;;  %v2494_v54 = vadd.f32 %v3671_v53, %v5115_v55 }
 0x69b   : > { %v2488_v56 = vpop.f32.mrf.mxu0 }
 0x69c   : > { %2592 = vst [vmem:[%s5120_s25 + $0x78] sm:$0xff] %v2494_v54  ;;  %v2489_v57 = vadd.f32 %v5115_v55, %v2488_v56 }
 0x69d   : > { %v3674_v58 = vpop.f32.mrf.mxu0 }
 0x69e   : > { %2591 = vst [vmem:[%s5120_s25 + $0x70] sm:$0xff] %v2489_v57  ;;  %v2504_v59 = vadd.f32 %v3674_v58, %v5115_v55 }
 0x69f   : > { %v2498_v60 = vpop.f32.mrf.mxu0 }
 0x6a0   : > { %2594 = vst [vmem:[%s5120_s25 + $0x88] sm:$0xff] %v2504_v59  ;;  %v2499_v62 = vadd.f32 %v5115_v55, %v2498_v60 }
 0x6a1   : > { %v3677_v63 = vpop.f32.mrf.mxu0 }
 0x6a2   : > { %2593 = vst [vmem:[%s5120_s25 + $0x80] sm:$0xff] %v2499_v62  ;;  %v2514_v0 = vadd.f32 %v3677_v63, %v5115_v55 }
 0x6a3   : > { %v2508_v1 = vpop.f32.mrf.mxu0 }
 0x6a4   : > { %2596 = vst [vmem:[%s5120_s25 + $0x98] sm:$0xff] %v2514_v0  ;;  %v2509_v2 = vadd.f32 %v5115_v55, %v2508_v1 }
 0x6a5   : > { %v3680_v32 = vpop.f32.mrf.mxu0 }
 0x6a6   : > { %2595 = vst [vmem:[%s5120_s25 + $0x90] sm:$0xff] %v2509_v2  ;;  %v2524_v3 = vadd.f32 %v3680_v32, %v5115_v55 }
 0x6a7   : > { %v2518_v4 = vpop.f32.mrf.mxu0 }
 0x6a8   : > { %2598 = vst [vmem:[%s5120_s25 + $0xa8] sm:$0xff] %v2524_v3  ;;  %v2519_v5 = vadd.f32 %v5115_v55, %v2518_v4 }
 0x6a9   : > { %v3683_v6 = vpop.f32.mrf.mxu0 }
 0x6aa   : > { %2597 = vst [vmem:[%s5120_s25 + $0xa0] sm:$0xff] %v2519_v5  ;;  %v2534_v8 = vadd.f32 %v3683_v6, %v5115_v55 }
 0x6ab   : > { %v2528_v9 = vpop.f32.mrf.mxu0 }
 0x6ac   : > { %2600 = vst [vmem:[%s5120_s25 + $0xb8] sm:$0xff] %v2534_v8  ;;  %v2529_v10 = vadd.f32 %v5115_v55, %v2528_v9 }
 0x6ad   : > { %v3686_v11 = vpop.f32.mrf.mxu0 }
 0x6ae   : > { %2599 = vst [vmem:[%s5120_s25 + $0xb0] sm:$0xff] %v2529_v10  ;;  %v2544_v12 = vadd.f32 %v3686_v11, %v5115_v55 }
 0x6af   : > { %v2538_v13 = vpop.f32.mrf.mxu0 }
 0x6b0   : > { %2602 = vst [vmem:[%s5120_s25 + $0xc8] sm:$0xff] %v2544_v12  ;;  %v2539_v14 = vadd.f32 %v5115_v55, %v2538_v13 }
 0x6b1   : > { %v3689_v15 = vpop.f32.mrf.mxu0 }
 0x6b2   : > { %2601 = vst [vmem:[%s5120_s25 + $0xc0] sm:$0xff] %v2539_v14  ;;  %v2554_v16 = vadd.f32 %v3689_v15, %v5115_v55 }
 0x6b3   : > { %v2548_v17 = vpop.f32.mrf.mxu0 }
 0x6b4   : > { %2604 = vst [vmem:[%s5120_s25 + $0xd8] sm:$0xff] %v2554_v16  ;;  %v2549_v46 = vadd.f32 %v5115_v55, %v2548_v17 }
 0x6b5   : > { %v3692_v19 = vpop.f32.mrf.mxu0 }
 0x6b6   : > { %2603 = vst [vmem:[%s5120_s25 + $0xd0] sm:$0xff] %v2549_v46  ;;  %v2564_v20 = vadd.f32 %v3692_v19, %v5115_v55 }
 0x6b7   : > { %v2558_v21 = vpop.f32.mrf.mxu0 }
 0x6b8   : > { %2606 = vst [vmem:[%s5120_s25 + $0xe8] sm:$0xff] %v2564_v20  ;;  %v2559_v22 = vadd.f32 %v5115_v55, %v2558_v21 }
 0x6b9   : > { %v3695_v23 = vpop.f32.mrf.mxu0 }
 0x6ba   : > { %2605 = vst [vmem:[%s5120_s25 + $0xe0] sm:$0xff] %v2559_v22  ;;  %v2574_v24 = vadd.f32 %v3695_v23, %v5115_v55 }
 0x6bb   : > { %v2568_v25 = vpop.f32.mrf.mxu0 }
 0x6bc   : > { %2608 = vst [vmem:[%s5120_s25 + $0xf8] sm:$0xff] %v2574_v24  ;;  %v2569_v26 = vadd.f32 %v5115_v55, %v2568_v25 }
 0x6be   : > { %2607 = vst [vmem:[%s5120_s25 + $0xf0] sm:$0xff] %v2569_v26 }
 0x6bf   : > { %4456 = shalt.err (!%p4453_p8)
}
 0x6c0   : > { %s4457_s28 = scalar_lea.hbm %s5187_s29, 4096  ;;  %s4461_s25 = scalar_lea.hbm %s5294_s23, 8192 }
 0x6c1   : > { %p4458_p6 = scmp.ne.s32.totalorder %s5187_s29, %s4457_s28  ;;  %p4462_p0 = scmp.lt.s32.totalorder %s5187_s29, %s5294_s23 }
 0x6c2   : > { %p4463_p2 = scmp.lt.s32.totalorder %s4461_s25, %s4457_s28 }
 0x6c3   : > { %p4459_p11 = pnand %p4458_p6, %p5295_p9 }
 0x6c4   : > { %p4464_p5 = por %p4463_p2, %p4462_p0 }
 0x6c5   : > { %p4460_p7 = pneg %p4459_p11 }
 0x6c7   : > { %p4465_p10 = pnand %p4464_p5, %p4460_p7 }
 0x6c9   : > { %4468 = shalt.err (!%p4465_p10)
}
 0x6ca   : > { %s4536_s26 = smov 128   ;;  %s4537_s15 = smov 8  }
 0x6cb   : > { %3758 = dma.vmem_to_hbm [thread:$0]  (%p5295_p9), %s5189_s22, 4096, %s5187_s29, %s2610_s24, %s4536_s26, %s4536_s26, %s4537_s15  }
 0x6cc PF: > { %s2638_s9 = sand.u32 1, %s4511_s18   ;;  %p5296_p12 = scmp.ne.s32.totalorder %s5279_s27, 0 }
 0x6cd   : > { %p5297_p13 = scmp.ge.s32.totalorder %s4523_s21, 2  ;;  %s2639_s17 = scalar_lea.sflag [#allocation4], %s2638_s9 }
 0x6cf   : > { %p3787_p1 = pnand %p5297_p13, %p5296_p12 }
 0x6d1   : > { %p3788_p3 = pneg %p3787_p1 }
 0x6d3   : > { %4506 = dma.done.wait (%p3788_p3), %s2639_s17, 4096  }
 0x6d4   : > { %4508 = vsyncadd (%p3788_p3), %s2639_s17, 4294963200  ;;  %p32_p4 = scmp.ge.s32.totalorder %s4749_s16, 4   ;;  %s5298_s18 = smov %s4515_s19 }
 0x6d5   : > { %s5299_s19 = smov %s4519_s20  ;;  %s5300_s20 = smov %s4761_s30 }
 0x6d6   : > { %s5301_s21 = smov %s4749_s16  ;;  %34 = sbr.rel (!%p32_p4) target bundleno = 19 (0x13), region = 153 }
 0x6db   :  { %2644 = vsyncpa [#allocation3], 1 }
 0x6dc   :  { %2646 = vsyncpa [#allocation3 + $0x1], 1 }
 0x6dd   :  { %2647 = vsyncpa [#allocation6], 1 }
 0x6de   :  { %2648 = vsyncpa [#allocation9], 1 }
 0x6df   :  { %2649 = vsyncpa [#allocation12], 1 }
 0x6e0   :  { %2650 = vsyncpa [#allocation15], 1 }
 0x6e1   :  { %2651 = vsyncpa [#allocation4], 1 }
 0x6e2   :  { %2653 = vsyncpa [#allocation4 + $0x1], 1 }

</bundles_post_ra>
